<compile_context>
chip_gen: v7x
topology: tpu7x:2x2x1
jax: 0.10.0
libtpu: 0.0.40
codegen_flags: <defaults>
</compile_context>

<pallas_src>
import math

import jax
import jax.numpy as jnp
from jax.experimental import pallas as pl
from jax.experimental.pallas import tpu as pltpu


def _round_up(n: int, m: int) -> int:
    return ((n + m - 1) // m) * m


# ---------------------------------------------------------------------------
# Kernel: one batch tile of the fused MLP (matmul -> bias -> ReLU -> matmul -> bias)
# ---------------------------------------------------------------------------
def mlp_kernel(x_ref, w1_ref, b1_ref, w2_ref, b2_ref, o_ref):
    # x: [bt, D_in] f32 (cast to bf16 here, right before the MXU),
    # w1: [D_in, H] bf16, b1: [1, H] f32, w2: [H, D_out] bf16, b2: [1, D_out] f32.
    x_bf = x_ref[...].astype(jnp.bfloat16)
    h = jnp.dot(x_bf, w1_ref[...], preferred_element_type=jnp.float32)
    h = jnp.maximum(h + b1_ref[...], 0.0)                 # f32 bias + ReLU (VPU)
    y = jnp.dot(h.astype(w2_ref.dtype), w2_ref[...],      # bf16 into MXU
                preferred_element_type=jnp.float32)
    o_ref[...] = (y + b2_ref[...]).astype(o_ref.dtype)


# ---------------------------------------------------------------------------
# One-time parameter preparation (hoisted out of the forward path)
# ---------------------------------------------------------------------------
def prepare_params(w1, b1, w2, b2):
    """Convert f32 params (already stored as [in, out]) to kernel layout once:
    bf16 weights for the MXU, f32 biases (shape [1, out]) for the VPU adds."""
    return (w1.astype(jnp.bfloat16),
            b1.reshape(1, -1).astype(jnp.float32),
            w2.astype(jnp.bfloat16),
            b2.reshape(1, -1).astype(jnp.float32))


# ---------------------------------------------------------------------------
# Wrapper: batch tiling over a 1-D "parallel" grid; weights stay VMEM-resident
# ---------------------------------------------------------------------------
def engine_forward(x, w1_bf16, b1_f32, w2_bf16, b2_f32, *,
                   b_tile=1024, out_dtype=None):
    """Equivalent of Engine.forward(x) for 2-D x of shape [B, D_in]."""
    batch, d_in = x.shape
    d_hidden = w1_bf16.shape[1]
    d_out = w2_bf16.shape[1]
    out_dtype = x.dtype if out_dtype is None else out_dtype

    # Batch tile: multiple of 16, capped at 4096 (v7x VMEM), and split into
    # >= 2 grid steps when possible so megacore gets both TensorCores busy.
    bt = max(16, min(b_tile, _round_up(batch, 16), 4096))
    if batch >= 32 and pl.cdiv(batch, bt) < 2:
        bt = _round_up(pl.cdiv(batch, 2), 16)
    grid = (pl.cdiv(batch, bt),)

    # Only raise the scoped-VMEM limit when the hidden activation would exceed
    # the v5e 16 MiB default (bt >= 2048); otherwise leave it alone.
    hidden_bytes = bt * d_hidden * 4
    vmem_limit = None
    if hidden_bytes > (8 << 20):
        vmem_limit = min(int(3 * hidden_bytes), 96 << 20)

    # Advisory cost: 2 matmuls + HBM traffic (x + weights + biases + out).
    flops = 2 * batch * (d_in * d_hidden + d_hidden * d_out)
    bytes_accessed = (x.size * x.dtype.itemsize
                      + w1_bf16.size * 2 + w2_bf16.size * 2
                      + b1_f32.size * 4 + b2_f32.size * 4
                      + batch * d_out * jnp.dtype(out_dtype).itemsize)
    cost = pl.CostEstimate(flops=flops, transcendentals=0,
                           bytes_accessed=bytes_accessed)

    return pl.pallas_call(
        mlp_kernel,
        out_shape=jax.ShapeDtypeStruct((batch, d_out), out_dtype),
        grid=grid,
        in_specs=[
            pl.BlockSpec((bt, d_in), lambda i: (i, 0)),           # x: streamed f32
            pl.BlockSpec((d_in, d_hidden), lambda i: (0, 0)),     # w1: resident
            pl.BlockSpec((1, d_hidden), lambda i: (0, 0)),        # b1: resident
            pl.BlockSpec((d_hidden, d_out), lambda i: (0, 0)),    # w2: resident
            pl.BlockSpec((1, d_out), lambda i: (0, 0)),           # b2: resident
        ],
        out_specs=pl.BlockSpec((bt, d_out), lambda i: (i, 0)),
        compiler_params=pltpu.CompilerParams(
            dimension_semantics=("parallel",),     # megacore sharding on v7x
            vmem_limit_bytes=vmem_limit),
        cost_estimate=cost,
    )(x, w1_bf16, b1_f32, w2_bf16, b2_f32)


# ---------------------------------------------------------------------------
# Deterministic parameter init (mimics torch.nn.Linear's U(-1/sqrt(fan_in), ..))
# ---------------------------------------------------------------------------
def init_params(key, d_in, d_hidden, d_out, dtype=jnp.float32):
    k1, k2, k3, k4 = jax.random.split(key, 4)
    bound1 = 1.0 / math.sqrt(d_in)
    bound2 = 1.0 / math.sqrt(d_hidden)
    # Stored transposed relative to PyTorch (so the kernel computes x @ W).
    w1 = jax.random.uniform(k1, (d_in, d_hidden), dtype, -bound1, bound1)
    b1 = jax.random.uniform(k2, (1, d_hidden), dtype, -bound1, bound1)
    w2 = jax.random.uniform(k3, (d_hidden, d_out), dtype, -bound2, bound2)
    b2 = jax.random.uniform(k4, (1, d_out), dtype, -bound2, bound2)
    return w1, b1, w2, b2


# ---------------------------------------------------------------------------
# Main
# ---------------------------------------------------------------------------
if __name__ == "__main__":
    D_IN, D_HIDDEN, D_OUT = 32, 1024, 32
    BATCH = 200   # non-multiple of the tile: exercises the masked ragged block

    key = jax.random.PRNGKey(0)
    key_x, key_p = jax.random.split(key)

    x = jax.random.normal(key_x, (BATCH, D_IN), dtype=jnp.float32)
    w1, b1, w2, b2 = init_params(key_p, D_IN, D_HIDDEN, D_OUT)

    # One-time layout/dtype prep, outside the forward path.
    params = prepare_params(w1, b1, w2, b2)

    # Pallas kernel result (bt is auto-split into 2 grid steps of 112 rows).
    y = engine_forward(x, *params)
    y = jax.block_until_ready(y)

    # Pure-JAX f32 reference; tolerance loosened for bf16 MXU inputs.
    y_ref = jnp.maximum(x @ w1 + b1, 0.0) @ w2 + b2
    assert y.shape == (BATCH, D_OUT)
    assert jnp.allclose(y, y_ref, atol=5e-2, rtol=5e-2), "mismatch vs reference"

    print("KERNEL_OK")
</pallas_src>

<mosaic_0001>
module attributes {stable_mosaic.version = 11 : i64} {
  func.func @mlp_kernel(%arg0: i32, %arg1: memref<112x32xf32, #tpu.memory_space<vmem>>, %arg2: memref<32x1024xbf16, #tpu.memory_space<vmem>>, %arg3: memref<1x1024xf32, #tpu.memory_space<vmem>>, %arg4: memref<1024x32xbf16, #tpu.memory_space<vmem>>, %arg5: memref<1x32xf32, #tpu.memory_space<vmem>>, %arg6: memref<112x32xf32, #tpu.memory_space<vmem>>) attributes {dimension_semantics = [#tpu.dimension_semantics<parallel>], iteration_bounds = array<i64: 2>, scalar_prefetch = 0 : i64, scratch_operands = 0 : i64, tpu.core_type = #tpu.core_type<tc>, window_params = [{transform_indices = @transform_0, window_bounds = array<i64: 112, 32>}, {pipeline_mode = #tpu.pipeline_mode<synchronous>, transform_indices = @transform_1, window_bounds = array<i64: 32, 1024>}, {pipeline_mode = #tpu.pipeline_mode<synchronous>, transform_indices = @transform_2, window_bounds = array<i64: 1, 1024>}, {pipeline_mode = #tpu.pipeline_mode<synchronous>, transform_indices = @transform_3, window_bounds = array<i64: 1024, 32>}, {pipeline_mode = #tpu.pipeline_mode<synchronous>, transform_indices = @transform_4, window_bounds = array<i64: 1, 32>}, {transform_indices = @transform_5, window_bounds = array<i64: 112, 32>}]} {
    %c0 = arith.constant 0 : index
    %c0_0 = arith.constant 0 : index
    %0 = vector.load %arg1[%c0, %c0_0] : memref<112x32xf32, #tpu.memory_space<vmem>>, vector<112x32xf32>
    %1 = arith.truncf %0 : vector<112x32xf32> to vector<112x32xbf16>
    %c0_1 = arith.constant 0 : index
    %c0_2 = arith.constant 0 : index
    %2 = vector.load %arg2[%c0_1, %c0_2] : memref<32x1024xbf16, #tpu.memory_space<vmem>>, vector<32x1024xbf16>
    %cst = arith.constant dense<0.000000e+00> : vector<112x1024xf32>
    %3 = tpu.matmul %1, %2, %cst {dimension_numbers = #tpu.dot_dimension_numbers<[1], [0], [0], [1], [0, 0, 1, 1], [], []>} : vector<112x32xbf16>, vector<32x1024xbf16>, vector<112x1024xf32> -> vector<112x1024xf32>
    %c0_3 = arith.constant 0 : index
    %c0_4 = arith.constant 0 : index
    %4 = vector.load %arg3[%c0_3, %c0_4] : memref<1x1024xf32, #tpu.memory_space<vmem>>, vector<1x1024xf32>
    %5 = vector.broadcast %4 : vector<1x1024xf32> to vector<112x1024xf32>
    %6 = arith.addf %3, %5 : vector<112x1024xf32>
    %cst_5 = arith.constant 0.000000e+00 : f32
    %7 = vector.broadcast %cst_5 : f32 to vector<112x1024xf32>
    %8 = arith.maximumf %6, %7 : vector<112x1024xf32>
    %9 = arith.truncf %8 : vector<112x1024xf32> to vector<112x1024xbf16>
    %c0_6 = arith.constant 0 : index
    %c0_7 = arith.constant 0 : index
    %10 = vector.load %arg4[%c0_6, %c0_7] : memref<1024x32xbf16, #tpu.memory_space<vmem>>, vector<1024x32xbf16>
    %cst_8 = arith.constant dense<0.000000e+00> : vector<112x32xf32>
    %11 = tpu.matmul %9, %10, %cst_8 {dimension_numbers = #tpu.dot_dimension_numbers<[1], [0], [0], [1], [0, 0, 1, 1], [], []>} : vector<112x1024xbf16>, vector<1024x32xbf16>, vector<112x32xf32> -> vector<112x32xf32>
    %c0_9 = arith.constant 0 : index
    %c0_10 = arith.constant 0 : index
    %12 = vector.load %arg5[%c0_9, %c0_10] : memref<1x32xf32, #tpu.memory_space<vmem>>, vector<1x32xf32>
    %13 = vector.broadcast %12 : vector<1x32xf32> to vector<112x32xf32>
    %14 = arith.addf %11, %13 : vector<112x32xf32>
    %c0_11 = arith.constant 0 : index
    %c0_12 = arith.constant 0 : index
    %15 = vector.load %arg6[%c0_11, %c0_12] : memref<112x32xf32, #tpu.memory_space<vmem>>, vector<112x32xf32>
    tpu.vector_store %arg6[%c0_11, %c0_12], %14 {strides = array<i32>} : memref<112x32xf32, #tpu.memory_space<vmem>>, vector<112x32xf32>,
    return
  }
  func.func @transform_0(%arg0: i32) -> (i32, i32) {
    %c0_i32 = arith.constant 0 : i32
    %c0_i32_0 = arith.constant 0 : i32
    return %arg0, %c0_i32 : i32, i32
  }
  func.func @transform_1(%arg0: i32) -> (i32, i32) {
    %c0_i32 = arith.constant 0 : i32
    %c0_i32_0 = arith.constant 0 : i32
    %c0_i32_1 = arith.constant 0 : i32
    return %c0_i32, %c0_i32_0 : i32, i32
  }
  func.func @transform_2(%arg0: i32) -> (i32, i32) {
    %c0_i32 = arith.constant 0 : i32
    %c0_i32_0 = arith.constant 0 : i32
    %c0_i32_1 = arith.constant 0 : i32
    return %c0_i32, %c0_i32_0 : i32, i32
  }
  func.func @transform_3(%arg0: i32) -> (i32, i32) {
    %c0_i32 = arith.constant 0 : i32
    %c0_i32_0 = arith.constant 0 : i32
    %c0_i32_1 = arith.constant 0 : i32
    return %c0_i32, %c0_i32_0 : i32, i32
  }
  func.func @transform_4(%arg0: i32) -> (i32, i32) {
    %c0_i32 = arith.constant 0 : i32
    %c0_i32_0 = arith.constant 0 : i32
    %c0_i32_1 = arith.constant 0 : i32
    return %c0_i32, %c0_i32_0 : i32, i32
  }
  func.func @transform_5(%arg0: i32) -> (i32, i32) {
    %c0_i32 = arith.constant 0 : i32
    %c0_i32_0 = arith.constant 0 : i32
    return %arg0, %c0_i32 : i32, i32
  }
}

</mosaic_0001>

<bundles_post_ra>
// kernel: tpu_custom_call.1
= control target key start
LH: loop header
LB: loop body
LE: loop exit
PB: predicated region body
PF: predicated region fallthrough
CT: control target
= control target key end

     0   :  { %s2803_s18 = smov 0   ;;  %s2805_s19 = smov 0   ;;  %s3528_s0 = inlined_call_operand.vmem [shape: f32[200,32], index: 0, kind: input, shape index: {}]   ;;  %s3529_s1 = inlined_call_operand.vmem [shape: bf16[32,1024], index: 1, kind: input, shape index: {}]   ;;  %s3530_s2 = inlined_call_operand.vmem [shape: f32[1,1024], index: 2, kind: input, shape index: {}]   ;;  %s3531_s3 = inlined_call_operand.vmem [shape: bf16[1024,32], index: 3, kind: input, shape index: {}]   ;;  %s3532_s4 = inlined_call_operand.vmem [shape: f32[1,32], index: 4, kind: input, shape index: {}]   ;;  %s3533_s5 = inlined_call_operand.vmem [shape: f32[200,32], index: 5, kind: output, shape index: {}]  }
   0x1   :  { %s2807_s20 = smov 0  }
   0x2 LB: > { %s2816_s21 = sadd.s32 4294967295, %s2738_s20   ;;  %s2818_s22 = sadd.s32 1, %s2738_s20   ;;  %s2738_s20 = sphi %s2807_s20, %s3540_s20   ;;  %s2734_s19 = sphi %s2805_s19, %s3539_s19   ;;  %s2730_s18 = sphi %s2803_s18, %s3538_s18  }
   0x3   : > { %s129_s23 = ssub.s32 %s2738_s20, %s2818_s22  ;;  %s132_s24 = sadd.s32 1, %s2734_s19 }
   0x4   : > { %p130_p0 = scmp.eq.s32.totalorder %s129_s23, 0  ;;  %p142_p1 = scmp.ne.s32.totalorder %s2734_s19, %s2730_s18 }
   0x5   : > { %p143_p2 = scmp.eq.s32.totalorder %s2816_s21, 1  ;;  %p2169_p3 = scmp.ge.s32.totalorder %s2738_s20, 1 }
   0x6   : > { %s2826_s25 = scalar_select %p130_p0, %s2734_s19, %s132_s24  }
   0x7   : > { %p2828_p4 = por %p143_p2, %p142_p1  ;;  %p196_p5 = scmp.lt.s32.totalorder %s2738_s20, 3 }
   0x9   : > { %p197_p6 = pnand %p2169_p3, %p196_p5 }
   0xa   : > { %v268_v0 = vld [vmem:[%s3529_s1] sm:$0xff] (!%p197_p6)  ;;  %v269_v2 = vld [vmem:[%s3529_s1 + $0x8] sm:$0xff] (!%p197_p6)  ;;  %s2842_s8 = smul.u32 (!%p197_p6), 14, %s2816_s21  ;;  %v2772_v8 = vmov (!%p197_p6), 0   ;;  %v270_v14 = vld [vmem:[%s3529_s1 + $0x10] sm:$0xff] (!%p197_p6)  ;;  %vm406_vm0 = vcmask (!%p197_p6), 261120  }
   0xb   : > { %200 = sbr.rel (%p197_p6) target bundleno = 634 (0x27a), region = 40  ;;  %v272_v1 = vld [vmem:[%s3529_s1 + $0x20] sm:$0xff] (!%p197_p6)  ;;  %v273_v4 = vld [vmem:[%s3529_s1 + $0x28] sm:$0xff] (!%p197_p6)  ;;  %460 = vmatprep.mubr.bf16.mxu0 (!%p197_p6), %v2772_v8  ;;  %563 = vmatprep.mubr.bf16.mxu1 (!%p197_p6), %v2772_v8  ;;  %v274_v16 = vld [vmem:[%s3529_s1 + $0x30] sm:$0xff] (!%p197_p6)  ;;  %s224_s10 = sand.u32 (!%p197_p6), 1, %s2730_s18  }
   0xc   : > { %v2172_v3 = vcombine.high (!%p197_p6), %v268_v0, %v272_v1  ;;  %v2171_v5 = vcombine.low (!%p197_p6), %v268_v0, %v272_v1  ;;  %v276_v6 = vld [vmem:[%s3529_s1 + $0x40] sm:$0xff] (!%p197_p6)  ;;  %v2174_v9 = vcombine.high (!%p197_p6), %v269_v2, %v273_v4  ;;  %v2173_v10 = vcombine.low (!%p197_p6), %v269_v2, %v273_v4  ;;  %v277_v12 = vld [vmem:[%s3529_s1 + $0x48] sm:$0xff] (!%p197_p6)  ;;  %p232_p7 = scmp.lt.s32.totalorder (!%p197_p6), %s2842_s8, 24  ;;  %v271_v17 = vld [vmem:[%s3529_s1 + $0x18] sm:$0xff] (!%p197_p6)  ;;  %s2525_s11 = smul.u32 (!%p197_p6), 112, %s224_s10 }
   0xd   : > { %v280_v7 = vld [vmem:[%s3529_s1 + $0x60] sm:$0xff] (!%p197_p6)  ;;  %v281_v13 = vld [vmem:[%s3529_s1 + $0x68] sm:$0xff] (!%p197_p6)  ;;  %v275_v18 = vld [vmem:[%s3529_s1 + $0x38] sm:$0xff] (!%p197_p6)  ;;  %v2176_v21 = vcombine.high (!%p197_p6), %v270_v14, %v274_v16  ;;  %v2175_v28 = vcombine.low (!%p197_p6), %v270_v14, %v274_v16 }
   0xe   : > { %v2180_v11 = vcombine.high (!%p197_p6), %v276_v6, %v280_v7  ;;  %428 = vmatprep.subr.bf16.mxu0 (!%p197_p6), %v2172_v3  ;;  %v2182_v15 = vcombine.high (!%p197_p6), %v277_v12, %v281_v13  ;;  %531 = vmatprep.subr.bf16.mxu1 (!%p197_p6), %v2174_v9  ;;  %v2179_v19 = vcombine.low (!%p197_p6), %v276_v6, %v280_v7  ;;  %v278_v22 = vld [vmem:[%s3529_s1 + $0x50] sm:$0xff] (!%p197_p6)  ;;  %v279_v25 = vld [vmem:[%s3529_s1 + $0x58] sm:$0xff] (!%p197_p6)  ;;  %v2616_v38 = vld [vmem:[%s3531_s3 + $0x40] sm:$0xff] (!%p197_p6)   ;;  %s3395_s18 = scalar_lea.vmem (!%p197_p6), [#allocation2], %s2525_s11  }
   0xf   : > { %429 = vmatpush1.bf16.msra.mxu0 (!%p197_p6), %v2171_v5  ;;  %532 = vmatpush1.bf16.msra.mxu1 (!%p197_p6), %v2173_v10  ;;  %v2181_v20 = vcombine.low (!%p197_p6), %v277_v12, %v281_v13  ;;  %v2178_v23 = vcombine.high (!%p197_p6), %v271_v17, %v275_v18  ;;  %v282_v24 = vld [vmem:[%s3529_s1 + $0x70] sm:$0xff] (!%p197_p6)  ;;  %v283_v29 = vld [vmem:[%s3529_s1 + $0x78] sm:$0xff] (!%p197_p6)  ;;  %v2177_v31 = vcombine.low (!%p197_p6), %v271_v17, %v275_v18  ;;  %v2618_v39 = vld [vmem:[%s3531_s3 + $0xc0] sm:$0xff] (!%p197_p6)  }
  0x10   : > { %430 = vmatprep.subr.bf16.mxu0 (!%p197_p6), %v2180_v11  ;;  %533 = vmatprep.subr.bf16.mxu1 (!%p197_p6), %v2182_v15  ;;  %v2184_v32 = vcombine.high (!%p197_p6), %v278_v22, %v282_v24  ;;  %v2186_v33 = vcombine.high (!%p197_p6), %v279_v25, %v283_v29  ;;  %v2183_v36 = vcombine.low (!%p197_p6), %v278_v22, %v282_v24  ;;  %v2617_v56 = vld [vmem:[%s3531_s3] sm:$0xff] (!%p197_p6)   ;;  %v2620_v58 = vld [vmem:[%s3531_s3 + $0x48] sm:$0xff] (!%p197_p6)   ;;  %v2624_v62 = vld [vmem:[%s3531_s3 + $0x50] sm:$0xff] (!%p197_p6)  }
  0x11   : > { %v2185_v37 = vcombine.low (!%p197_p6), %v279_v25, %v283_v29  ;;  %v2619_v57 = vld [vmem:[%s3531_s3 + $0x80] sm:$0xff] (!%p197_p6)   ;;  %v2622_v59 = vld [vmem:[%s3531_s3 + $0xc8] sm:$0xff] (!%p197_p6)   ;;  %v2626_v63 = vld [vmem:[%s3531_s3 + $0xd0] sm:$0xff] (!%p197_p6)   ;;  %v286_v25 = vlaneseq (!%p197_p6) }
  0x12   : > { %s233_s9 = scalar_select %p232_p7, %s2842_s8, 24  ;;  %v2621_v60 = vld [vmem:[%s3531_s3 + $0x8] sm:$0xff]   ;;  %v2625_v0 = vld [vmem:[%s3531_s3 + $0x10] sm:$0xff]   ;;  %v2628_v2 = vld [vmem:[%s3531_s3 + $0x58] sm:$0xff]  }
  0x13   : > { %431 = vmatpush1.bf16.msra.mxu0 %v2179_v19  ;;  %534 = vmatpush1.bf16.msra.mxu1 %v2181_v20  ;;  %v2623_v61 = vld [vmem:[%s3531_s3 + $0x88] sm:$0xff]   ;;  %v2627_v1 = vld [vmem:[%s3531_s3 + $0x90] sm:$0xff]   ;;  %v2630_v3 = vld [vmem:[%s3531_s3 + $0xd8] sm:$0xff]   ;;  %s2292_s13 = smul.u32 (%p2828_p4), 112, %s2816_s21 }
  0x14   : > { %s2170_s12 = sshll.u32 %s233_s9, 3  ;;  %634 = vmatprep.subr.bf16.mxu0 %v2176_v21  ;;  %737 = vmatprep.subr.bf16.mxu1 %v2178_v23  ;;  %v2629_v4 = vld [vmem:[%s3531_s3 + $0x18] sm:$0xff]   ;;  %v2632_v6 = vld [vmem:[%s3531_s3 + $0x60] sm:$0xff]   ;;  %v2636_v11 = vld [vmem:[%s3531_s3 + $0x68] sm:$0xff]  }
  0x15   : > { %s2884_s17 = scalar_lea.vmem %s3528_s0, %s2170_s12  ;;  %v2631_v5 = vld [vmem:[%s3531_s3 + $0x98] sm:$0xff]   ;;  %v2634_v7 = vld [vmem:[%s3531_s3 + $0xe0] sm:$0xff]   ;;  %v2638_v12 = vld [vmem:[%s3531_s3 + $0xe8] sm:$0xff]   ;;  %s1905_s12 = ssub.s32 (%p2828_p4), 25, %s2842_s8 }
  0x16   : > { %v247_v26 = vld [vmem:[%s2884_s17] sm:$0xff]  ;;  %v248_v27 = vld [vmem:[%s2884_s17 + $0x8] sm:$0xff]  ;;  %v249_v34 = vld [vmem:[%s2884_s17 + $0x10] sm:$0xff]  ;;  %p1906_p8 = scmp.lt.s32.totalorder (%p2828_p4), %s1905_s12, 14  ;;  %s3444_s16 = scalar_lea.vmem (%p2828_p4), %s3533_s5, %s2292_s13  }
  0x17   : > { %v2894_v30 = vpack.c.bf16 %v248_v27, %v247_v26  ;;  %v250_v35 = vld [vmem:[%s2884_s17 + $0x18] sm:$0xff]  ;;  %v251_v41 = vld [vmem:[%s2884_s17 + $0x20] sm:$0xff]  ;;  %v252_v42 = vld [vmem:[%s2884_s17 + $0x28] sm:$0xff]  ;;  %v3104_v26 = vshrl.u32 %v286_v25, 7 }
  0x18   : > { %v2910_v40 = vpack.c.bf16 %v250_v35, %v249_v34  ;;  %v2920_v43 = vpack.c.bf16 %v252_v42, %v251_v41  ;;  %v253_v44 = vld [vmem:[%s2884_s17 + $0x30] sm:$0xff]  ;;  %v254_v45 = vld [vmem:[%s2884_s17 + $0x38] sm:$0xff]  ;;  %v255_v47 = vld [vmem:[%s2884_s17 + $0x40] sm:$0xff] }
  0x19   : > { %2187 = vmatmul.mubr.msk.bf16.vlgmr.msra.gmra.mrb[0].mxu0 %vm406_vm0, %v2894_v30  ;;  %2194 = vmatmul.mubr.msk.bf16.vlgmr.msra.gmra.mrb[0].mxu1 %vm406_vm0, %v2894_v30  ;;  %v2930_v46 = vpack.c.bf16 %v254_v45, %v253_v44  ;;  %v256_v48 = vld [vmem:[%s2884_s17 + $0x48] sm:$0xff]  ;;  %v257_v50 = vld [vmem:[%s2884_s17 + $0x50] sm:$0xff]  ;;  %v258_v51 = vld [vmem:[%s2884_s17 + $0x58] sm:$0xff]  ;;  %v292_v29 = vsub.s32 1, %v3104_v26 }
  0x1a   : > { %635 = vmatpush1.bf16.msra.mxu0 %v2175_v28  ;;  %738 = vmatpush1.bf16.msra.mxu1 %v2177_v31  ;;  %v2940_v49 = vpack.c.bf16 %v256_v48, %v255_v47  ;;  %v2950_v52 = vpack.c.bf16 %v258_v51, %v257_v50  ;;  %v259_v53 = vld [vmem:[%s2884_s17 + $0x60] sm:$0xff]  ;;  %v260_v54 = vld [vmem:[%s2884_s17 + $0x68] sm:$0xff]  ;;  %v2640_v15 = vld [vmem:[%s3531_s3 + $0x70] sm:$0xff]   ;;  %v296_v28 = vsub.s32 2, %v3104_v26 }
  0x1b   : > { %470 = vmatprep.mubr.bf16.mxu0 %v2772_v8  ;;  %573 = vmatprep.mubr.bf16.mxu1 %v2772_v8  ;;  %v2960_v55 = vpack.c.bf16 %v260_v54, %v259_v53  ;;  %v2633_v9 = vld [vmem:[%s3531_s3 + $0x20] sm:$0xff]   ;;  %v2637_v13 = vld [vmem:[%s3531_s3 + $0x28] sm:$0xff]   ;;  %v2642_v16 = vld [vmem:[%s3531_s3 + $0xf0] sm:$0xff]  }
  0x1c   : > { %636 = vmatprep.subr.bf16.mxu0 %v2184_v32  ;;  %739 = vmatprep.subr.bf16.mxu1 %v2186_v33  ;;  %v2635_v10 = vld [vmem:[%s3531_s3 + $0xa0] sm:$0xff]   ;;  %v2639_v14 = vld [vmem:[%s3531_s3 + $0xa8] sm:$0xff]   ;;  %v2641_v17 = vld [vmem:[%s3531_s3 + $0x30] sm:$0xff]  }
  0x1d   : > { %v2643_v18 = vld [vmem:[%s3531_s3 + $0xb0] sm:$0xff]   ;;  %v2644_v19 = vld [vmem:[%s3531_s3 + $0x78] sm:$0xff]   ;;  %v2648_v23 = vld [vmem:[%s3531_s3 + $0x140] sm:$0xff]  }
  0x1e   : > { %637 = vmatpush1.bf16.msra.mxu0 %v2183_v36  ;;  %740 = vmatpush1.bf16.msra.mxu1 %v2185_v37  ;;  %v2646_v20 = vld [vmem:[%s3531_s3 + $0xf8] sm:$0xff]   ;;  %v2650_v24 = vld [vmem:[%s3531_s3 + $0x1c0] sm:$0xff]   ;;  %v2655_v25 = vld [vmem:[%s3531_s3 + $0x188] sm:$0xff]  }
  0x1f   : > { %2293 = vmatprep.subr.bf16.mxu0 %v2616_v38  ;;  %2351 = vmatprep.subr.bf16.mxu1 %v2618_v39  ;;  %v2645_v21 = vld [vmem:[%s3531_s3 + $0x38] sm:$0xff]   ;;  %v3110_v27 = vld [vmem:[%s3530_s2] sm:$0xff] }
  0x20   : > { %v2647_v22 = vld [vmem:[%s3531_s3 + $0xb8] sm:$0xff]   ;;  %v3119_v32 = vrot.slane %v3110_v27, %v296_v28  ;;  %v3122_v33 = vrot.slane %v3110_v27, %v292_v29 }
  0x21   : > { %2188 = vmatmul.mubr.msk.bf16.gmra.mrb[4].mxu0 %vm406_vm0, %v2910_v40  ;;  %2195 = vmatmul.mubr.msk.bf16.gmra.mrb[4].mxu1 %vm406_vm0, %v2910_v40 }
  0x22   : > { %480 = vmatprep.mubr.bf16.mxu0 %v2772_v8  ;;  %583 = vmatprep.mubr.bf16.mxu1 %v2772_v8 }
  0x29   : > { %2189 = vmatmul.mubr.msk.bf16.gmra.mrb[8].mxu0 %vm406_vm0, %v2920_v43  ;;  %2196 = vmatmul.mubr.msk.bf16.gmra.mrb[8].mxu1 %vm406_vm0, %v2920_v43 }
  0x2a   : > { %490 = vmatprep.mubr.bf16.mxu0 %v2772_v8  ;;  %593 = vmatprep.mubr.bf16.mxu1 %v2772_v8 }
  0x31   : > { %2190 = vmatmul.mubr.msk.bf16.gmra.mrb[12].mxu0 %vm406_vm0, %v2930_v46  ;;  %2197 = vmatmul.mubr.msk.bf16.gmra.mrb[12].mxu1 %vm406_vm0, %v2930_v46 }
  0x32   : > { %500 = vmatprep.mubr.bf16.mxu0 %v2772_v8  ;;  %603 = vmatprep.mubr.bf16.mxu1 %v2772_v8 }
  0x39   : > { %2191 = vmatmul.mubr.msk.bf16.gmra.mrb[16].mxu0 %vm406_vm0, %v2940_v49  ;;  %2198 = vmatmul.mubr.msk.bf16.gmra.mrb[16].mxu1 %vm406_vm0, %v2940_v49 }
  0x3a   : > { %510 = vmatprep.mubr.bf16.mxu0 %v2772_v8  ;;  %613 = vmatprep.mubr.bf16.mxu1 %v2772_v8 }
  0x41   : > { %2192 = vmatmul.mubr.msk.bf16.gmra.mrb[20].mxu0 %vm406_vm0, %v2950_v52  ;;  %2199 = vmatmul.mubr.msk.bf16.gmra.mrb[20].mxu1 %vm406_vm0, %v2950_v52 }
  0x42   : > { %520 = vmatprep.mubr.bf16.mxu0 %v2772_v8  ;;  %623 = vmatprep.mubr.bf16.mxu1 %v2772_v8 }
  0x49   : > { %2193 = vmatmul.mubr.msk.bf16.gmra.mrb[24].mxu0 %vm406_vm0, %v2960_v55  ;;  %2200 = vmatmul.mubr.msk.bf16.gmra.mrb[24].mxu1 %vm406_vm0, %v2960_v55 }
  0x4a   : > { %666 = vmatprep.mubr.bf16.mxu0 %v2772_v8  ;;  %769 = vmatprep.mubr.bf16.mxu1 %v2772_v8 }
  0x51   : > { %2201 = vmatmul.mubr.msk.bf16.vlgmr.msra.gmra.mrb[28].mxu0 %vm406_vm0, %v2894_v30  ;;  %2208 = vmatmul.mubr.msk.bf16.vlgmr.msra.gmra.mrb[28].mxu1 %vm406_vm0, %v2894_v30  ;;  %v300_v30 = vsub.s32 3, %v3104_v26 }
  0x52   : > { %676 = vmatprep.mubr.bf16.mxu0 %v2772_v8  ;;  %779 = vmatprep.mubr.bf16.mxu1 %v2772_v8 }
  0x53   : > { %2294 = vmatpush3.bf16.msra.mxu0 %v2617_v56  ;;  %2352 = vmatpush3.bf16.msra.mxu1 %v2619_v57  ;;  %v3125_v34 = vrot.slane %v3110_v27, %v300_v30 }
  0x54   : > { %2295 = vmatprep.subr.bf16.mxu0 %v2620_v58  ;;  %2353 = vmatprep.subr.bf16.mxu1 %v2622_v59 }
  0x57   : > { %2296 = vmatpush3.bf16.msra.mxu0 %v2621_v60  ;;  %2354 = vmatpush3.bf16.msra.mxu1 %v2623_v61 }
  0x58   : > { %2297 = vmatprep.subr.bf16.mxu0 %v2624_v62  ;;  %2355 = vmatprep.subr.bf16.mxu1 %v2626_v63  ;;  %v2649_v63 = vld [vmem:[%s3531_s3 + $0x100] sm:$0xff]  }
  0x59   : > { %2202 = vmatmul.mubr.msk.bf16.gmra.mrb[32].mxu0 %vm406_vm0, %v2910_v40  ;;  %2209 = vmatmul.mubr.msk.bf16.gmra.mrb[32].mxu1 %vm406_vm0, %v2910_v40 }
  0x5a   : > { %686 = vmatprep.mubr.bf16.mxu0 %v2772_v8  ;;  %789 = vmatprep.mubr.bf16.mxu1 %v2772_v8 }
  0x5b   : > { %2298 = vmatpush3.bf16.msra.mxu0 %v2625_v0  ;;  %2356 = vmatpush3.bf16.msra.mxu1 %v2627_v1 }
  0x5c   : > { %2299 = vmatprep.subr.bf16.mxu0 %v2628_v2  ;;  %2357 = vmatprep.subr.bf16.mxu1 %v2630_v3 }
  0x5f   : > { %2300 = vmatpush3.bf16.msra.mxu0 %v2629_v4  ;;  %2358 = vmatpush3.bf16.msra.mxu1 %v2631_v5  ;;  %v2651_v4 = vld [vmem:[%s3531_s3 + $0x180] sm:$0xff]   ;;  %v2652_v5 = vld [vmem:[%s3531_s3 + $0x148] sm:$0xff]  }
  0x60   : > { %2301 = vmatprep.subr.bf16.mxu0 %v2632_v6  ;;  %2359 = vmatprep.subr.bf16.mxu1 %v2634_v7 }
  0x61   : > { %2203 = vmatmul.mubr.msk.bf16.gmra.mrb[36].mxu0 %vm406_vm0, %v2920_v43  ;;  %2210 = vmatmul.mubr.msk.bf16.gmra.mrb[36].mxu1 %vm406_vm0, %v2920_v43 }
  0x62   : > { %696 = vmatprep.mubr.bf16.mxu0 %v2772_v8  ;;  %799 = vmatprep.mubr.bf16.mxu1 %v2772_v8 }
  0x63   : > { %2302 = vmatpush3.bf16.msra.mxu0 %v2633_v9  ;;  %2360 = vmatpush3.bf16.msra.mxu1 %v2635_v10 }
  0x64   : > { %2303 = vmatprep.subr.bf16.mxu0 %v2636_v11  ;;  %2361 = vmatprep.subr.bf16.mxu1 %v2638_v12  ;;  %v2654_v11 = vld [vmem:[%s3531_s3 + $0x1c8] sm:$0xff]  }
  0x67   : > { %2304 = vmatpush3.bf16.msra.mxu0 %v2637_v13  ;;  %2362 = vmatpush3.bf16.msra.mxu1 %v2639_v14 }
  0x68   : > { %2305 = vmatprep.subr.bf16.mxu0 %v2640_v15  ;;  %2363 = vmatprep.subr.bf16.mxu1 %v2642_v16 }
  0x69   : > { %2204 = vmatmul.mubr.msk.bf16.gmra.mrb[40].mxu0 %vm406_vm0, %v2930_v46  ;;  %2211 = vmatmul.mubr.msk.bf16.gmra.mrb[40].mxu1 %vm406_vm0, %v2930_v46 }
  0x6a   : > { %706 = vmatprep.mubr.bf16.mxu0 %v2772_v8  ;;  %809 = vmatprep.mubr.bf16.mxu1 %v2772_v8 }
  0x6b   : > { %2306 = vmatpush3.bf16.msra.mxu0 %v2641_v17  ;;  %2364 = vmatpush3.bf16.msra.mxu1 %v2643_v18 }
  0x6c   : > { %2307 = vmatprep.subr.bf16.mxu0 %v2644_v19  ;;  %2365 = vmatprep.subr.bf16.mxu1 %v2646_v20  ;;  %v2653_v20 = vld [vmem:[%s3531_s3 + $0x108] sm:$0xff]  }
  0x6f   : > { %2308 = vmatpush3.bf16.msra.mxu0 %v2645_v21  ;;  %2366 = vmatpush3.bf16.msra.mxu1 %v2647_v22 }
  0x70   : > { %2409 = vmatprep.subr.bf16.mxu0 %v2648_v23  ;;  %2467 = vmatprep.subr.bf16.mxu1 %v2650_v24 }
  0x71   : > { %2205 = vmatmul.mubr.msk.bf16.gmra.mrb[44].mxu0 %vm406_vm0, %v2940_v49  ;;  %2212 = vmatmul.mubr.msk.bf16.gmra.mrb[44].mxu1 %vm406_vm0, %v2940_v49 }
  0x72   : > { %716 = vmatprep.mubr.bf16.mxu0 %v2772_v8  ;;  %819 = vmatprep.mubr.bf16.mxu1 %v2772_v8 }
  0x79   : > { %2206 = vmatmul.mubr.msk.bf16.gmra.mrb[48].mxu0 %vm406_vm0, %v2950_v52  ;;  %2213 = vmatmul.mubr.msk.bf16.gmra.mrb[48].mxu1 %vm406_vm0, %v2950_v52 }
  0x7a   : > { %726 = vmatprep.mubr.bf16.mxu0 %v2772_v8  ;;  %829 = vmatprep.mubr.bf16.mxu1 %v2772_v8  ;;  %v288_v8 = vsub.s32 0, %v3104_v26 }
  0x7c   : > { %v3116_v31 = vrot.slane %v3110_v27, %v288_v8  ;;  %v2656_v8 = vld [vmem:[%s3531_s3 + $0x150] sm:$0xff]  }
  0x81   : > { %2207 = vmatmul.mubr.msk.bf16.gmra.mrb[52].mxu0 %vm406_vm0, %v2960_v55  ;;  %2214 = vmatmul.mubr.msk.bf16.gmra.mrb[52].mxu1 %vm406_vm0, %v2960_v55 }
  0xec   : > { %v462_v35 = vpop.f32.mrb[0].mxu0  ;;  %v565_v37 = vpop.f32.mrb[0].mxu1 }
  0xed   : > { %v463_v36 = vadd.f32 %v462_v35, %v3116_v31  ;;  %v464_v38 = vpop.f32.mrb[1].mxu0  ;;  %v566_v39 = vadd.f32 %v565_v37, %v3119_v32  ;;  %v567_v41 = vpop.f32.mrb[1].mxu1  ;;  %v2658_v35 = vld [vmem:[%s3531_s3 + $0x1d0] sm:$0xff]  }
  0xee   : > { %v465_v40 = vadd.f32 %v464_v38, %v3122_v33  ;;  %v466_v42 = vpop.f32.mrb[2].mxu0  ;;  %v568_v43 = vadd.f32 %v567_v41, %v3125_v34  ;;  %v569_v45 = vpop.f32.mrb[2].mxu1  ;;  %v2657_v41 = vld [vmem:[%s3531_s3 + $0x110] sm:$0xff]  }
  0xef   : > { %v467_v44 = vadd.f32 %v466_v42, %v3116_v31  ;;  %v468_v46 = vpop.f32.mrb[3].mxu0  ;;  %v842_v47 = vmax.f32 %v566_v39, 0.0  ;;  %v570_v48 = vadd.f32 %v569_v45, %v3119_v32  ;;  %v571_v50 = vpop.f32.mrb[3].mxu1  ;;  %v840_v51 = vmax.f32 %v463_v36, 0.0 }
  0xf0   : > { %v469_v49 = vadd.f32 %v468_v46, %v3122_v33  ;;  %v843_v52 = vmax.f32 %v568_v43, 0.0  ;;  %v572_v54 = vadd.f32 %v571_v50, %v3125_v34  ;;  %v841_v55 = vmax.f32 %v465_v40, 0.0  ;;  %v2659_v46 = vld [vmem:[%s3531_s3 + $0x190] sm:$0xff]  }
  0xf1   : > { %v848_v53 = vmax.f32 %v467_v44, 0.0  ;;  %v850_v56 = vmax.f32 %v570_v48, 0.0 }
  0xf2   : > { %v849_v57 = vmax.f32 %v469_v49, 0.0  ;;  %v851_v59 = vmax.f32 %v572_v54, 0.0 }
  0xf3   : > { %v952_v58 = vpack.c.bf16 %v848_v53, %v840_v51  ;;  %v954_v60 = vpack.c.bf16 %v850_v56, %v842_v47  ;;  %v2660_v47 = vld [vmem:[%s3531_s3 + $0x158] sm:$0xff]  }
  0xf4   : > { %v953_v61 = vpack.c.bf16 %v849_v57, %v841_v55  ;;  %v472_v62 = vpop.f32.mrb[4].mxu0  ;;  %v955_v0 = vpack.c.bf16 %v851_v59, %v843_v52  ;;  %v575_v2 = vpop.f32.mrb[4].mxu1  ;;  %v2662_v52 = vld [vmem:[%s3531_s3 + $0x1d8] sm:$0xff]  }
  0xf5   : > { %v473_v1 = vadd.f32 %v472_v62, %v3116_v31  ;;  %v474_v3 = vpop.f32.mrb[5].mxu0  ;;  %v576_v6 = vadd.f32 %v575_v2, %v3119_v32  ;;  %v577_v9 = vpop.f32.mrb[5].mxu1  ;;  %v2663_v2 = vld [vmem:[%s3531_s3 + $0x198] sm:$0xff]  }
  0xf6   : > { %v475_v7 = vadd.f32 %v474_v3, %v3122_v33  ;;  %v476_v10 = vpop.f32.mrb[6].mxu0  ;;  %1559 = vmatprep.mubr.bf16.mxu0 %v953_v61  ;;  %v578_v12 = vadd.f32 %v577_v9, %v3125_v34  ;;  %v579_v14 = vpop.f32.mrb[6].mxu1  ;;  %1648 = vmatprep.mubr.bf16.mxu1 %v955_v0  ;;  %v2661_v61 = vld [vmem:[%s3531_s3 + $0x118] sm:$0xff]   ;;  %v2664_v3 = vld [vmem:[%s3531_s3 + $0x160] sm:$0xff]  }
  0xf7   : > { %v477_v13 = vadd.f32 %v476_v10, %v3116_v31  ;;  %v478_v15 = vpop.f32.mrb[7].mxu0  ;;  %1560 = vmatmul.mubr.bf16.vlgmr.msra.gmra.mrb[56].mxu0 %v952_v58  ;;  %v858_v16 = vmax.f32 %v576_v6, 0.0  ;;  %v580_v17 = vadd.f32 %v579_v14, %v3119_v32  ;;  %v581_v19 = vpop.f32.mrb[7].mxu1  ;;  %1649 = vmatmul.mubr.bf16.vlgmr.msra.gmra.mrb[56].mxu1 %v954_v60  ;;  %v856_v21 = vmax.f32 %v473_v1, 0.0  ;;  %v2665_v14 = vld [vmem:[%s3531_s3 + $0x120] sm:$0xff]  }
  0xf8   : > { %v479_v18 = vadd.f32 %v478_v15, %v3122_v33  ;;  %2410 = vmatpush3.bf16.msra.mxu0 %v2649_v63  ;;  %v859_v22 = vmax.f32 %v578_v12, 0.0  ;;  %v582_v24 = vadd.f32 %v581_v19, %v3125_v34  ;;  %2468 = vmatpush3.bf16.msra.mxu1 %v2651_v4  ;;  %v857_v28 = vmax.f32 %v475_v7, 0.0  ;;  %v2666_v7 = vld [vmem:[%s3531_s3 + $0x1e0] sm:$0xff]  }
  0xf9   : > { %v864_v23 = vmax.f32 %v477_v13, 0.0  ;;  %2411 = vmatprep.subr.bf16.mxu0 %v2652_v5  ;;  %v866_v29 = vmax.f32 %v580_v17, 0.0  ;;  %2469 = vmatprep.subr.bf16.mxu1 %v2654_v11  ;;  %v2667_v19 = vld [vmem:[%s3531_s3 + $0x1a0] sm:$0xff]  }
  0xfa   : > { %v865_v30 = vmax.f32 %v479_v18, 0.0  ;;  %v867_v37 = vmax.f32 %v582_v24, 0.0 }
  0xfb   : > { %v960_v36 = vpack.c.bf16 %v864_v23, %v856_v21  ;;  %v962_v38 = vpack.c.bf16 %v866_v29, %v858_v16 }
  0xfc   : > { %v961_v39 = vpack.c.bf16 %v865_v30, %v857_v28  ;;  %v482_v40 = vpop.f32.mrb[8].mxu0  ;;  %2412 = vmatpush3.bf16.msra.mxu0 %v2653_v20  ;;  %v963_v42 = vpack.c.bf16 %v867_v37, %v859_v22  ;;  %v585_v44 = vpop.f32.mrb[8].mxu1  ;;  %2470 = vmatpush3.bf16.msra.mxu1 %v2655_v25  ;;  %v2668_v20 = vld [vmem:[%s3531_s3 + $0x168] sm:$0xff]  }
  0xfd   : > { %v483_v43 = vadd.f32 %v482_v40, %v3116_v31  ;;  %v484_v45 = vpop.f32.mrb[9].mxu0  ;;  %2413 = vmatprep.subr.bf16.mxu0 %v2656_v8  ;;  %v586_v48 = vadd.f32 %v585_v44, %v3119_v32  ;;  %v587_v50 = vpop.f32.mrb[9].mxu1  ;;  %2471 = vmatprep.subr.bf16.mxu1 %v2658_v35  ;;  %v2670_v25 = vld [vmem:[%s3531_s3 + $0x1e8] sm:$0xff]  }
  0xfe   : > { %v485_v49 = vadd.f32 %v484_v45, %v3122_v33  ;;  %v486_v51 = vpop.f32.mrb[10].mxu0  ;;  %1567 = vmatprep.mubr.bf16.mxu0 %v961_v39  ;;  %v588_v53 = vadd.f32 %v587_v50, %v3125_v34  ;;  %v589_v55 = vpop.f32.mrb[10].mxu1  ;;  %1656 = vmatprep.mubr.bf16.mxu1 %v963_v42  ;;  %v2669_v39 = vld [vmem:[%s3531_s3 + $0x128] sm:$0xff]   ;;  %v2672_v45 = vld [vmem:[%s3531_s3 + $0x170] sm:$0xff]  }
  0xff   : > { %v487_v54 = vadd.f32 %v486_v51, %v3116_v31  ;;  %v488_v56 = vpop.f32.mrb[11].mxu0  ;;  %1568 = vmatmul.mubr.bf16.gmra.mrb[60].mxu0 %v960_v36  ;;  %v874_v57 = vmax.f32 %v586_v48, 0.0  ;;  %v590_v58 = vadd.f32 %v589_v55, %v3119_v32  ;;  %v591_v60 = vpop.f32.mrb[11].mxu1  ;;  %1657 = vmatmul.mubr.bf16.gmra.mrb[60].mxu1 %v962_v38  ;;  %v872_v62 = vmax.f32 %v483_v43, 0.0  ;;  %v2671_v44 = vld [vmem:[%s3531_s3 + $0x1a8] sm:$0xff]   ;;  %v2673_v55 = vld [vmem:[%s3531_s3 + $0x130] sm:$0xff]  }
 0x100   : > { %v489_v59 = vadd.f32 %v488_v56, %v3122_v33  ;;  %2414 = vmatpush3.bf16.msra.mxu0 %v2657_v41  ;;  %v875_v63 = vmax.f32 %v588_v53, 0.0  ;;  %v592_v1 = vadd.f32 %v591_v60, %v3125_v34  ;;  %2472 = vmatpush3.bf16.msra.mxu1 %v2659_v46  ;;  %v873_v4 = vmax.f32 %v485_v49, 0.0  ;;  %v2674_v49 = vld [vmem:[%s3531_s3 + $0x1f0] sm:$0xff]  }
 0x101   : > { %v880_v0 = vmax.f32 %v487_v54, 0.0  ;;  %2415 = vmatprep.subr.bf16.mxu0 %v2660_v47  ;;  %v882_v5 = vmax.f32 %v590_v58, 0.0  ;;  %2473 = vmatprep.subr.bf16.mxu1 %v2662_v52  ;;  %v2675_v60 = vld [vmem:[%s3531_s3 + $0x1b0] sm:$0xff]  }
 0x102   : > { %v881_v6 = vmax.f32 %v489_v59, 0.0  ;;  %v883_v10 = vmax.f32 %v592_v1, 0.0 }
 0x103   : > { %v968_v9 = vpack.c.bf16 %v880_v0, %v872_v62  ;;  %v970_v11 = vpack.c.bf16 %v882_v5, %v874_v57 }
 0x104   : > { %v969_v12 = vpack.c.bf16 %v881_v6, %v873_v4  ;;  %v492_v13 = vpop.f32.mrb[12].mxu0  ;;  %2416 = vmatpush3.bf16.msra.mxu0 %v2661_v61  ;;  %v971_v15 = vpack.c.bf16 %v883_v10, %v875_v63  ;;  %v595_v17 = vpop.f32.mrb[12].mxu1  ;;  %2474 = vmatpush3.bf16.msra.mxu1 %v2663_v2  ;;  %v2676_v61 = vld [vmem:[%s3531_s3 + $0x178] sm:$0xff]  }
 0x105   : > { %v493_v16 = vadd.f32 %v492_v13, %v3116_v31  ;;  %v494_v18 = vpop.f32.mrb[13].mxu0  ;;  %2417 = vmatprep.subr.bf16.mxu0 %v2664_v3  ;;  %v596_v21 = vadd.f32 %v595_v17, %v3119_v32  ;;  %v597_v23 = vpop.f32.mrb[13].mxu1  ;;  %2475 = vmatprep.subr.bf16.mxu1 %v2666_v7  ;;  %v2678_v2 = vld [vmem:[%s3531_s3 + $0x1f8] sm:$0xff]  }
 0x106   : > { %v495_v22 = vadd.f32 %v494_v18, %v3122_v33  ;;  %v496_v24 = vpop.f32.mrb[14].mxu0  ;;  %1575 = vmatprep.mubr.bf16.mxu0 %v969_v12  ;;  %v598_v8 = vadd.f32 %v597_v23, %v3125_v34  ;;  %v599_v29 = vpop.f32.mrb[14].mxu1  ;;  %1664 = vmatprep.mubr.bf16.mxu1 %v971_v15  ;;  %v2677_v12 = vld [vmem:[%s3531_s3 + $0x138] sm:$0xff]  }
 0x107   : > { %v497_v28 = vadd.f32 %v496_v24, %v3116_v31  ;;  %v498_v30 = vpop.f32.mrb[15].mxu0  ;;  %1576 = vmatmul.mubr.bf16.gmra.mrb[64].mxu0 %v968_v9  ;;  %v890_v35 = vmax.f32 %v596_v21, 0.0  ;;  %v600_v36 = vadd.f32 %v599_v29, %v3119_v32  ;;  %v601_v38 = vpop.f32.mrb[15].mxu1  ;;  %1665 = vmatmul.mubr.bf16.gmra.mrb[64].mxu1 %v970_v11  ;;  %v888_v40 = vmax.f32 %v493_v16, 0.0  ;;  %v2679_v17 = vld [vmem:[%s3531_s3 + $0x1b8] sm:$0xff]  }
 0x108   : > { %v499_v37 = vadd.f32 %v498_v30, %v3122_v33  ;;  %2418 = vmatpush3.bf16.msra.mxu0 %v2665_v14  ;;  %v891_v41 = vmax.f32 %v598_v8, 0.0  ;;  %v602_v43 = vadd.f32 %v601_v38, %v3125_v34  ;;  %2476 = vmatpush3.bf16.msra.mxu1 %v2667_v19  ;;  %v889_v46 = vmax.f32 %v495_v22, 0.0 }
 0x109   : > { %v896_v42 = vmax.f32 %v497_v28, 0.0  ;;  %2419 = vmatprep.subr.bf16.mxu0 %v2668_v20  ;;  %v898_v47 = vmax.f32 %v600_v36, 0.0  ;;  %2477 = vmatprep.subr.bf16.mxu1 %v2670_v25 }
 0x10a   : > { %v897_v48 = vmax.f32 %v499_v37, 0.0  ;;  %v899_v51 = vmax.f32 %v602_v43, 0.0 }
 0x10b   : > { %v976_v50 = vpack.c.bf16 %v896_v42, %v888_v40  ;;  %v978_v52 = vpack.c.bf16 %v898_v47, %v890_v35 }
 0x10c   : > { %v977_v53 = vpack.c.bf16 %v897_v48, %v889_v46  ;;  %v502_v54 = vpop.f32.mrb[16].mxu0  ;;  %2420 = vmatpush3.bf16.msra.mxu0 %v2669_v39  ;;  %v979_v56 = vpack.c.bf16 %v899_v51, %v891_v41  ;;  %v605_v58 = vpop.f32.mrb[16].mxu1  ;;  %2478 = vmatpush3.bf16.msra.mxu1 %v2671_v44 }
 0x10d   : > { %v503_v57 = vadd.f32 %v502_v54, %v3116_v31  ;;  %v504_v59 = vpop.f32.mrb[17].mxu0  ;;  %2421 = vmatprep.subr.bf16.mxu0 %v2672_v45  ;;  %v606_v62 = vadd.f32 %v605_v58, %v3119_v32  ;;  %v607_v0 = vpop.f32.mrb[17].mxu1  ;;  %2479 = vmatprep.subr.bf16.mxu1 %v2674_v49 }
 0x10e   : > { %v505_v63 = vadd.f32 %v504_v59, %v3122_v33  ;;  %v506_v1 = vpop.f32.mrb[18].mxu0  ;;  %1583 = vmatprep.mubr.bf16.mxu0 %v977_v53  ;;  %v608_v3 = vadd.f32 %v607_v0, %v3125_v34  ;;  %v609_v5 = vpop.f32.mrb[18].mxu1  ;;  %1672 = vmatprep.mubr.bf16.mxu1 %v979_v56  ;;  %v304_v56 = vsub.s32 4, %v3104_v26 }
 0x10f   : > { %v507_v4 = vadd.f32 %v506_v1, %v3116_v31  ;;  %v508_v6 = vpop.f32.mrb[19].mxu0  ;;  %1584 = vmatmul.mubr.bf16.gmra.mrb[68].mxu0 %v976_v50  ;;  %v906_v7 = vmax.f32 %v606_v62, 0.0  ;;  %v610_v9 = vadd.f32 %v609_v5, %v3119_v32  ;;  %v611_v11 = vpop.f32.mrb[19].mxu1  ;;  %1673 = vmatmul.mubr.bf16.gmra.mrb[68].mxu1 %v978_v52  ;;  %v904_v13 = vmax.f32 %v503_v57, 0.0 }
 0x110   : > { %v509_v10 = vadd.f32 %v508_v6, %v3122_v33  ;;  %2422 = vmatpush3.bf16.msra.mxu0 %v2673_v55  ;;  %v907_v14 = vmax.f32 %v608_v3, 0.0  ;;  %v612_v16 = vadd.f32 %v611_v11, %v3125_v34  ;;  %2480 = vmatpush3.bf16.msra.mxu1 %v2675_v60  ;;  %v905_v18 = vmax.f32 %v505_v63, 0.0 }
 0x111   : > { %v912_v15 = vmax.f32 %v507_v4, 0.0  ;;  %2423 = vmatprep.subr.bf16.mxu0 %v2676_v61  ;;  %v914_v19 = vmax.f32 %v610_v9, 0.0  ;;  %2481 = vmatprep.subr.bf16.mxu1 %v2678_v2  ;;  %v308_v60 = vsub.s32 5, %v3104_v26  ;;  %v312_v5 = vsub.s32 6, %v3104_v26 }
 0x112   : > { %v913_v20 = vmax.f32 %v509_v10, 0.0  ;;  %v915_v22 = vmax.f32 %v612_v16, 0.0  ;;  %v3274_v11 = vrot.slane %v3110_v27, %v304_v56 }
 0x113   : > { %v984_v21 = vpack.c.bf16 %v912_v15, %v904_v13  ;;  %v986_v23 = vpack.c.bf16 %v914_v19, %v906_v7 }
 0x114   : > { %v985_v24 = vpack.c.bf16 %v913_v20, %v905_v18  ;;  %v512_v25 = vpop.f32.mrb[20].mxu0  ;;  %2424 = vmatpush3.bf16.msra.mxu0 %v2677_v12  ;;  %v987_v8 = vpack.c.bf16 %v915_v22, %v907_v14  ;;  %v615_v29 = vpop.f32.mrb[20].mxu1  ;;  %2482 = vmatpush3.bf16.msra.mxu1 %v2679_v17  ;;  %v316_v12 = vsub.s32 7, %v3104_v26  ;;  %v3280_v17 = vrot.slane %v3110_v27, %v308_v60 }
 0x115   : > { %v513_v28 = vadd.f32 %v512_v25, %v3116_v31  ;;  %v514_v30 = vpop.f32.mrb[21].mxu0  ;;  %v616_v35 = vadd.f32 %v615_v29, %v3119_v32  ;;  %v617_v37 = vpop.f32.mrb[21].mxu1  ;;  %v3284_v26 = vrot.slane %v3110_v27, %v312_v5 }
 0x116   : > { %v515_v36 = vadd.f32 %v514_v30, %v3122_v33  ;;  %v516_v38 = vpop.f32.mrb[22].mxu0  ;;  %1591 = vmatprep.mubr.bf16.mxu0 %v985_v24  ;;  %v618_v39 = vadd.f32 %v617_v37, %v3125_v34  ;;  %v619_v41 = vpop.f32.mrb[22].mxu1  ;;  %1680 = vmatprep.mubr.bf16.mxu1 %v987_v8 }
 0x117   : > { %v517_v40 = vadd.f32 %v516_v38, %v3116_v31  ;;  %v518_v42 = vpop.f32.mrb[23].mxu0  ;;  %1592 = vmatmul.mubr.bf16.gmra.mrb[72].mxu0 %v984_v21  ;;  %v922_v43 = vmax.f32 %v616_v35, 0.0  ;;  %v620_v44 = vadd.f32 %v619_v41, %v3119_v32  ;;  %v621_v46 = vpop.f32.mrb[23].mxu1  ;;  %1681 = vmatmul.mubr.bf16.gmra.mrb[72].mxu1 %v986_v23  ;;  %v920_v47 = vmax.f32 %v513_v28, 0.0 }
 0x118   : > { %v519_v45 = vadd.f32 %v518_v42, %v3122_v33  ;;  %v923_v48 = vmax.f32 %v618_v39, 0.0  ;;  %v622_v50 = vadd.f32 %v621_v46, %v3125_v34  ;;  %v921_v51 = vmax.f32 %v515_v36, 0.0 }
 0x119   : > { %v928_v49 = vmax.f32 %v517_v40, 0.0  ;;  %v930_v52 = vmax.f32 %v620_v44, 0.0 }
 0x11a   : > { %v929_v53 = vmax.f32 %v519_v45, 0.0  ;;  %v931_v55 = vmax.f32 %v622_v50, 0.0 }
 0x11b   : > { %v992_v54 = vpack.c.bf16 %v928_v49, %v920_v47  ;;  %v994_v57 = vpack.c.bf16 %v930_v52, %v922_v43 }
 0x11c   : > { %v993_v58 = vpack.c.bf16 %v929_v53, %v921_v51  ;;  %v522_v59 = vpop.f32.mrb[24].mxu0  ;;  %v995_v61 = vpack.c.bf16 %v931_v55, %v923_v48  ;;  %v625_v63 = vpop.f32.mrb[24].mxu1 }
 0x11d   : > { %v523_v62 = vadd.f32 %v522_v59, %v3116_v31  ;;  %v524_v0 = vpop.f32.mrb[25].mxu0  ;;  %v626_v1 = vadd.f32 %v625_v63, %v3119_v32  ;;  %v627_v3 = vpop.f32.mrb[25].mxu1 }
 0x11e   : > { %v525_v2 = vadd.f32 %v524_v0, %v3122_v33  ;;  %v526_v4 = vpop.f32.mrb[26].mxu0  ;;  %1599 = vmatprep.mubr.bf16.mxu0 %v993_v58  ;;  %v628_v6 = vadd.f32 %v627_v3, %v3125_v34  ;;  %v629_v9 = vpop.f32.mrb[26].mxu1  ;;  %1688 = vmatprep.mubr.bf16.mxu1 %v995_v61 }
 0x11f   : > { %v527_v7 = vadd.f32 %v526_v4, %v3116_v31  ;;  %v528_v10 = vpop.f32.mrb[27].mxu0  ;;  %1600 = vmatmul.mubr.bf16.gmra.mrb[76].mxu0 %v992_v54  ;;  %v938_v13 = vmax.f32 %v626_v1, 0.0  ;;  %v630_v14 = vadd.f32 %v629_v9, %v3119_v32  ;;  %v631_v16 = vpop.f32.mrb[27].mxu1  ;;  %1689 = vmatmul.mubr.bf16.gmra.mrb[76].mxu1 %v994_v57  ;;  %v936_v31 = vmax.f32 %v523_v62, 0.0 }
 0x120   : > { %v529_v15 = vadd.f32 %v528_v10, %v3122_v33  ;;  %v939_v18 = vmax.f32 %v628_v6, 0.0  ;;  %v632_v20 = vadd.f32 %v631_v16, %v3125_v34  ;;  %v937_v21 = vmax.f32 %v525_v2, 0.0 }
 0x121   : > { %v944_v19 = vmax.f32 %v527_v7, 0.0  ;;  %v946_v22 = vmax.f32 %v630_v14, 0.0  ;;  %v3287_v33 = vrot.slane %v3110_v27, %v316_v12 }
 0x122   : > { %v945_v23 = vmax.f32 %v529_v15, 0.0  ;;  %v947_v32 = vmax.f32 %v632_v20, 0.0 }
 0x123   : > { %v1000_v24 = vpack.c.bf16 %v944_v19, %v936_v31  ;;  %v1002_v25 = vpack.c.bf16 %v946_v22, %v938_v13 }
 0x124   : > { %v1001_v8 = vpack.c.bf16 %v945_v23, %v937_v21  ;;  %v668_v28 = vpop.f32.mrb[28].mxu0  ;;  %v1003_v29 = vpack.c.bf16 %v947_v32, %v939_v18  ;;  %v771_v35 = vpop.f32.mrb[28].mxu1 }
 0x125   : > { %v669_v30 = vadd.f32 %v668_v28, %v3274_v11  ;;  %v670_v36 = vpop.f32.mrb[29].mxu0  ;;  %v772_v34 = vadd.f32 %v771_v35, %v3284_v26  ;;  %v773_v38 = vpop.f32.mrb[29].mxu1 }
 0x126   : > { %v671_v37 = vadd.f32 %v670_v36, %v3280_v17  ;;  %v672_v39 = vpop.f32.mrb[30].mxu0  ;;  %1607 = vmatprep.mubr.bf16.mxu0 %v1001_v8  ;;  %v774_v40 = vadd.f32 %v773_v38, %v3287_v33  ;;  %v775_v41 = vpop.f32.mrb[30].mxu1  ;;  %1696 = vmatprep.mubr.bf16.mxu1 %v1003_v29 }
 0x127   : > { %v673_v27 = vadd.f32 %v672_v39, %v3274_v11  ;;  %v674_v42 = vpop.f32.mrb[31].mxu0  ;;  %1608 = vmatmul.mubr.bf16.gmra.mrb[80].mxu0 %v1000_v24  ;;  %v846_v43 = vmax.f32 %v772_v34, 0.0  ;;  %v776_v44 = vadd.f32 %v775_v41, %v3284_v26  ;;  %v777_v46 = vpop.f32.mrb[31].mxu1  ;;  %1697 = vmatmul.mubr.bf16.gmra.mrb[80].mxu1 %v1002_v25  ;;  %v844_v47 = vmax.f32 %v669_v30, 0.0 }
 0x128   : > { %v675_v45 = vadd.f32 %v674_v42, %v3280_v17  ;;  %v847_v48 = vmax.f32 %v774_v40, 0.0  ;;  %v778_v50 = vadd.f32 %v777_v46, %v3287_v33  ;;  %v845_v51 = vmax.f32 %v671_v37, 0.0 }
 0x129   : > { %v852_v49 = vmax.f32 %v673_v27, 0.0  ;;  %v854_v52 = vmax.f32 %v776_v44, 0.0 }
 0x12a   : > { %v853_v53 = vmax.f32 %v675_v45, 0.0  ;;  %v855_v55 = vmax.f32 %v778_v50, 0.0 }
 0x12b   : > { %v956_v54 = vpack.c.bf16 %v852_v49, %v844_v47  ;;  %v958_v56 = vpack.c.bf16 %v854_v52, %v846_v43 }
 0x12c   : > { %v957_v57 = vpack.c.bf16 %v853_v53, %v845_v51  ;;  %v678_v58 = vpop.f32.mrb[32].mxu0  ;;  %v959_v59 = vpack.c.bf16 %v855_v55, %v847_v48  ;;  %v781_v61 = vpop.f32.mrb[32].mxu1 }
 0x12d   : > { %v679_v60 = vadd.f32 %v678_v58, %v3274_v11  ;;  %v680_v62 = vpop.f32.mrb[33].mxu0  ;;  %v782_v63 = vadd.f32 %v781_v61, %v3284_v26  ;;  %v783_v1 = vpop.f32.mrb[33].mxu1 }
 0x12e   : > { %v681_v0 = vadd.f32 %v680_v62, %v3280_v17  ;;  %v682_v2 = vpop.f32.mrb[34].mxu0  ;;  %1737 = vmatprep.mubr.bf16.mxu0 %v957_v57  ;;  %v784_v3 = vadd.f32 %v783_v1, %v3287_v33  ;;  %v785_v5 = vpop.f32.mrb[34].mxu1  ;;  %1826 = vmatprep.mubr.bf16.mxu1 %v959_v59 }
 0x12f   : > { %v683_v4 = vadd.f32 %v682_v2, %v3274_v11  ;;  %v684_v6 = vpop.f32.mrb[35].mxu0  ;;  %1738 = vmatmul.mubr.bf16.vlgmr.msra.gmra.mrb[84].mxu0 %v956_v54  ;;  %v862_v7 = vmax.f32 %v782_v63, 0.0  ;;  %v786_v9 = vadd.f32 %v785_v5, %v3284_v26  ;;  %v787_v12 = vpop.f32.mrb[35].mxu1  ;;  %1827 = vmatmul.mubr.bf16.vlgmr.msra.gmra.mrb[84].mxu1 %v958_v56  ;;  %v860_v13 = vmax.f32 %v679_v60, 0.0 }
 0x130   : > { %v685_v10 = vadd.f32 %v684_v6, %v3280_v17  ;;  %v863_v14 = vmax.f32 %v784_v3, 0.0  ;;  %v788_v16 = vadd.f32 %v787_v12, %v3287_v33  ;;  %v861_v31 = vmax.f32 %v681_v0, 0.0 }
 0x131   : > { %v868_v15 = vmax.f32 %v683_v4, 0.0  ;;  %v870_v18 = vmax.f32 %v786_v9, 0.0 }
 0x132   : > { %v869_v19 = vmax.f32 %v685_v10, 0.0  ;;  %v871_v21 = vmax.f32 %v788_v16, 0.0 }
 0x133   : > { %v964_v20 = vpack.c.bf16 %v868_v15, %v860_v13  ;;  %v966_v22 = vpack.c.bf16 %v870_v18, %v862_v7 }
 0x134   : > { %v965_v23 = vpack.c.bf16 %v869_v19, %v861_v31  ;;  %v688_v24 = vpop.f32.mrb[36].mxu0  ;;  %v967_v32 = vpack.c.bf16 %v871_v21, %v863_v14  ;;  %v791_v8 = vpop.f32.mrb[36].mxu1 }
 0x135   : > { %v689_v25 = vadd.f32 %v688_v24, %v3274_v11  ;;  %v690_v28 = vpop.f32.mrb[37].mxu0  ;;  %v792_v29 = vadd.f32 %v791_v8, %v3284_v26  ;;  %v793_v35 = vpop.f32.mrb[37].mxu1 }
 0x136   : > { %v691_v30 = vadd.f32 %v690_v28, %v3280_v17  ;;  %v692_v36 = vpop.f32.mrb[38].mxu0  ;;  %1745 = vmatprep.mubr.bf16.mxu0 %v965_v23  ;;  %v794_v34 = vadd.f32 %v793_v35, %v3287_v33  ;;  %v795_v38 = vpop.f32.mrb[38].mxu1  ;;  %1834 = vmatprep.mubr.bf16.mxu1 %v967_v32 }
 0x137   : > { %v693_v37 = vadd.f32 %v692_v36, %v3274_v11  ;;  %v694_v39 = vpop.f32.mrb[39].mxu0  ;;  %1746 = vmatmul.mubr.bf16.gmra.mrb[88].mxu0 %v964_v20  ;;  %v878_v40 = vmax.f32 %v792_v29, 0.0  ;;  %v796_v27 = vadd.f32 %v795_v38, %v3284_v26  ;;  %v797_v42 = vpop.f32.mrb[39].mxu1  ;;  %1835 = vmatmul.mubr.bf16.gmra.mrb[88].mxu1 %v966_v22  ;;  %v876_v43 = vmax.f32 %v689_v25, 0.0 }
 0x138   : > { %v695_v41 = vadd.f32 %v694_v39, %v3280_v17  ;;  %v879_v44 = vmax.f32 %v794_v34, 0.0  ;;  %v798_v46 = vadd.f32 %v797_v42, %v3287_v33  ;;  %v877_v47 = vmax.f32 %v691_v30, 0.0 }
 0x139   : > { %v884_v45 = vmax.f32 %v693_v37, 0.0  ;;  %v886_v48 = vmax.f32 %v796_v27, 0.0 }
 0x13a   : > { %v885_v49 = vmax.f32 %v695_v41, 0.0  ;;  %v887_v51 = vmax.f32 %v798_v46, 0.0 }
 0x13b   : > { %v972_v50 = vpack.c.bf16 %v884_v45, %v876_v43  ;;  %v974_v52 = vpack.c.bf16 %v886_v48, %v878_v40 }
 0x13c   : > { %v973_v53 = vpack.c.bf16 %v885_v49, %v877_v47  ;;  %v698_v54 = vpop.f32.mrb[40].mxu0  ;;  %v975_v55 = vpack.c.bf16 %v887_v51, %v879_v44  ;;  %v801_v57 = vpop.f32.mrb[40].mxu1 }
 0x13d   : > { %v699_v56 = vadd.f32 %v698_v54, %v3274_v11  ;;  %v700_v58 = vpop.f32.mrb[41].mxu0  ;;  %v802_v59 = vadd.f32 %v801_v57, %v3284_v26  ;;  %v803_v61 = vpop.f32.mrb[41].mxu1 }
 0x13e   : > { %v701_v60 = vadd.f32 %v700_v58, %v3280_v17  ;;  %v702_v62 = vpop.f32.mrb[42].mxu0  ;;  %1753 = vmatprep.mubr.bf16.mxu0 %v973_v53  ;;  %v804_v63 = vadd.f32 %v803_v61, %v3287_v33  ;;  %v805_v1 = vpop.f32.mrb[42].mxu1  ;;  %1842 = vmatprep.mubr.bf16.mxu1 %v975_v55 }
 0x13f   : > { %v703_v0 = vadd.f32 %v702_v62, %v3274_v11  ;;  %v704_v2 = vpop.f32.mrb[43].mxu0  ;;  %1754 = vmatmul.mubr.bf16.gmra.mrb[92].mxu0 %v972_v50  ;;  %v894_v3 = vmax.f32 %v802_v59, 0.0  ;;  %v806_v4 = vadd.f32 %v805_v1, %v3284_v26  ;;  %v807_v6 = vpop.f32.mrb[43].mxu1  ;;  %1843 = vmatmul.mubr.bf16.gmra.mrb[92].mxu1 %v974_v52  ;;  %v892_v7 = vmax.f32 %v699_v56, 0.0 }
 0x140   : > { %v705_v5 = vadd.f32 %v704_v2, %v3280_v17  ;;  %v895_v9 = vmax.f32 %v804_v63, 0.0  ;;  %v808_v12 = vadd.f32 %v807_v6, %v3287_v33  ;;  %v893_v13 = vmax.f32 %v701_v60, 0.0 }
 0x141   : > { %v900_v10 = vmax.f32 %v703_v0, 0.0  ;;  %v902_v14 = vmax.f32 %v806_v4, 0.0 }
 0x142   : > { %v901_v15 = vmax.f32 %v705_v5, 0.0  ;;  %v903_v31 = vmax.f32 %v808_v12, 0.0 }
 0x143   : > { %v980_v16 = vpack.c.bf16 %v900_v10, %v892_v7  ;;  %v982_v18 = vpack.c.bf16 %v902_v14, %v894_v3 }
 0x144   : > { %v981_v19 = vpack.c.bf16 %v901_v15, %v893_v13  ;;  %v708_v20 = vpop.f32.mrb[44].mxu0  ;;  %v983_v21 = vpack.c.bf16 %v903_v31, %v895_v9  ;;  %v811_v23 = vpop.f32.mrb[44].mxu1 }
 0x145   : > { %v709_v22 = vadd.f32 %v708_v20, %v3274_v11  ;;  %v710_v24 = vpop.f32.mrb[45].mxu0  ;;  %v812_v32 = vadd.f32 %v811_v23, %v3284_v26  ;;  %v813_v8 = vpop.f32.mrb[45].mxu1 }
 0x146   : > { %v711_v25 = vadd.f32 %v710_v24, %v3280_v17  ;;  %v712_v28 = vpop.f32.mrb[46].mxu0  ;;  %1761 = vmatprep.mubr.bf16.mxu0 %v981_v19  ;;  %v814_v29 = vadd.f32 %v813_v8, %v3287_v33  ;;  %v815_v35 = vpop.f32.mrb[46].mxu1  ;;  %1850 = vmatprep.mubr.bf16.mxu1 %v983_v21 }
 0x147   : > { %v713_v30 = vadd.f32 %v712_v28, %v3274_v11  ;;  %v714_v36 = vpop.f32.mrb[47].mxu0  ;;  %1762 = vmatmul.mubr.bf16.gmra.mrb[96].mxu0 %v980_v16  ;;  %v910_v34 = vmax.f32 %v812_v32, 0.0  ;;  %v816_v37 = vadd.f32 %v815_v35, %v3284_v26  ;;  %v817_v39 = vpop.f32.mrb[47].mxu1  ;;  %1851 = vmatmul.mubr.bf16.gmra.mrb[96].mxu1 %v982_v18  ;;  %v908_v40 = vmax.f32 %v709_v22, 0.0 }
 0x148   : > { %v715_v38 = vadd.f32 %v714_v36, %v3280_v17  ;;  %v911_v27 = vmax.f32 %v814_v29, 0.0  ;;  %v818_v42 = vadd.f32 %v817_v39, %v3287_v33  ;;  %v909_v43 = vmax.f32 %v711_v25, 0.0 }
 0x149   : > { %v916_v41 = vmax.f32 %v713_v30, 0.0  ;;  %v918_v44 = vmax.f32 %v816_v37, 0.0 }
 0x14a   : > { %v917_v45 = vmax.f32 %v715_v38, 0.0  ;;  %v919_v47 = vmax.f32 %v818_v42, 0.0 }
 0x14b   : > { %v988_v46 = vpack.c.bf16 %v916_v41, %v908_v40  ;;  %v990_v48 = vpack.c.bf16 %v918_v44, %v910_v34 }
 0x14c   : > { %v989_v49 = vpack.c.bf16 %v917_v45, %v909_v43  ;;  %v718_v50 = vpop.f32.mrb[48].mxu0  ;;  %v991_v51 = vpack.c.bf16 %v919_v47, %v911_v27  ;;  %v821_v53 = vpop.f32.mrb[48].mxu1 }
 0x14d   : > { %v719_v52 = vadd.f32 %v718_v50, %v3274_v11  ;;  %v720_v54 = vpop.f32.mrb[49].mxu0  ;;  %v822_v55 = vadd.f32 %v821_v53, %v3284_v26  ;;  %v823_v57 = vpop.f32.mrb[49].mxu1 }
 0x14e   : > { %v721_v56 = vadd.f32 %v720_v54, %v3280_v17  ;;  %v722_v58 = vpop.f32.mrb[50].mxu0  ;;  %1769 = vmatprep.mubr.bf16.mxu0 %v989_v49  ;;  %v824_v59 = vadd.f32 %v823_v57, %v3287_v33  ;;  %v825_v61 = vpop.f32.mrb[50].mxu1  ;;  %1858 = vmatprep.mubr.bf16.mxu1 %v991_v51 }
 0x14f   : > { %v723_v60 = vadd.f32 %v722_v58, %v3274_v11  ;;  %v724_v62 = vpop.f32.mrb[51].mxu0  ;;  %1770 = vmatmul.mubr.bf16.gmra.mrb[100].mxu0 %v988_v46  ;;  %v926_v63 = vmax.f32 %v822_v55, 0.0  ;;  %v826_v0 = vadd.f32 %v825_v61, %v3284_v26  ;;  %v827_v2 = vpop.f32.mrb[51].mxu1  ;;  %1859 = vmatmul.mubr.bf16.gmra.mrb[100].mxu1 %v990_v48  ;;  %v924_v3 = vmax.f32 %v719_v52, 0.0  ;;  %v3348_v46 = vld [vmem:[%s3532_s4] ss:$0 sm:$0xff] }
 0x150   : > { %v725_v1 = vadd.f32 %v724_v62, %v3280_v17  ;;  %v927_v4 = vmax.f32 %v824_v59, 0.0  ;;  %v828_v6 = vadd.f32 %v827_v2, %v3287_v33  ;;  %v925_v7 = vmax.f32 %v721_v56, 0.0 }
 0x151   : > { %v932_v5 = vmax.f32 %v723_v60, 0.0  ;;  %v934_v9 = vmax.f32 %v826_v0, 0.0 }
 0x152   : > { %v933_v10 = vmax.f32 %v725_v1, 0.0  ;;  %v935_v13 = vmax.f32 %v828_v6, 0.0 }
 0x153   : > { %v996_v12 = vpack.c.bf16 %v932_v5, %v924_v3  ;;  %v998_v14 = vpack.c.bf16 %v934_v9, %v926_v63 }
 0x154   : > { %v997_v15 = vpack.c.bf16 %v933_v10, %v925_v7  ;;  %v728_v16 = vpop.f32.mrb[52].mxu0  ;;  %v999_v31 = vpack.c.bf16 %v935_v13, %v927_v4  ;;  %v831_v19 = vpop.f32.mrb[52].mxu1 }
 0x155   : > { %v729_v18 = vadd.f32 %v728_v16, %v3274_v11  ;;  %v730_v20 = vpop.f32.mrb[53].mxu0  ;;  %v832_v21 = vadd.f32 %v831_v19, %v3284_v26  ;;  %v833_v23 = vpop.f32.mrb[53].mxu1 }
 0x156   : > { %v731_v22 = vadd.f32 %v730_v20, %v3280_v17  ;;  %v732_v24 = vpop.f32.mrb[54].mxu0  ;;  %1777 = vmatprep.mubr.bf16.mxu0 %v997_v15  ;;  %v834_v32 = vadd.f32 %v833_v23, %v3287_v33  ;;  %v835_v8 = vpop.f32.mrb[54].mxu1  ;;  %1866 = vmatprep.mubr.bf16.mxu1 %v999_v31 }
 0x157   : > { %v733_v25 = vadd.f32 %v732_v24, %v3274_v11  ;;  %v734_v28 = vpop.f32.mrb[55].mxu0  ;;  %1778 = vmatmul.mubr.bf16.gmra.mrb[104].mxu0 %v996_v12  ;;  %v942_v29 = vmax.f32 %v832_v21, 0.0  ;;  %v836_v30 = vadd.f32 %v835_v8, %v3284_v26  ;;  %v837_v36 = vpop.f32.mrb[55].mxu1  ;;  %1867 = vmatmul.mubr.bf16.gmra.mrb[104].mxu1 %v998_v14  ;;  %v940_v34 = vmax.f32 %v729_v18, 0.0 }
 0x158   : > { %v735_v35 = vadd.f32 %v734_v28, %v3280_v17  ;;  %v943_v37 = vmax.f32 %v834_v32, 0.0  ;;  %v838_v39 = vadd.f32 %v837_v36, %v3287_v33  ;;  %v941_v40 = vmax.f32 %v731_v22, 0.0 }
 0x159   : > { %v948_v38 = vmax.f32 %v733_v25, 0.0  ;;  %v950_v27 = vmax.f32 %v836_v30, 0.0 }
 0x15a   : > { %v949_v41 = vmax.f32 %v735_v35, 0.0  ;;  %v951_v42 = vmax.f32 %v838_v39, 0.0 }
 0x15b   : > { %v1004_v11 = vpack.c.bf16 %v948_v38, %v940_v34  ;;  %v1006_v43 = vpack.c.bf16 %v950_v27, %v942_v29 }
 0x15c   : > { %v1005_v44 = vpack.c.bf16 %v949_v41, %v941_v40  ;;  %v1007_v45 = vpack.c.bf16 %v951_v42, %v943_v37 }
 0x15e   : > { %1785 = vmatprep.mubr.bf16.mxu0 %v1005_v44  ;;  %1874 = vmatprep.mubr.bf16.mxu1 %v1007_v45 }
 0x15f   : > { %1786 = vmatmul.mubr.bf16.gmra.mrb[108].mxu0 %v1004_v11  ;;  %1875 = vmatmul.mubr.bf16.gmra.mrb[108].mxu1 %v1006_v43 }
 0x1ca   : > { %v2309_v17 = vpop.f32.mrb[56].mxu0  ;;  %v2367_v26 = vpop.f32.mrb[56].mxu1 }
 0x1cb   : > { %v2310_v33 = vpop.f32.mrb[57].mxu0  ;;  %v2368_v48 = vpop.f32.mrb[57].mxu1 }
 0x1cc   : > { %v2311_v47 = vadd.f32 %v2310_v33, %v2309_v17  ;;  %v2312_v49 = vpop.f32.mrb[58].mxu0  ;;  %v2369_v50 = vadd.f32 %v2368_v48, %v2367_v26  ;;  %v2370_v51 = vpop.f32.mrb[58].mxu1 }
 0x1cd   : > { %v2313_v52 = vpop.f32.mrb[59].mxu0  ;;  %v2371_v55 = vpop.f32.mrb[59].mxu1 }
 0x1ce   : > { %v1562_v53 = vadd.f32 %v2311_v47, %v3348_v46  ;;  %v2314_v54 = vadd.f32 %v2313_v52, %v2312_v49  ;;  %v2372_v56 = vadd.f32 %v2371_v55, %v2370_v51 }
 0x1d0   : > { %v3351_v57 = vadd.f32 %v2369_v50, %v1562_v53  ;;  %v1565_v58 = vadd.f32 %v2314_v54, %v3348_v46 }
 0x1d2   : > { %v3354_v59 = vadd.f32 %v2372_v56, %v1565_v58  ;;  %v2315_v60 = vpop.f32.mrb[60].mxu0  ;;  %v2373_v61 = vpop.f32.mrb[60].mxu1 }
 0x1d3   : > { %v2316_v62 = vpop.f32.mrb[61].mxu0  ;;  %v2374_v0 = vpop.f32.mrb[61].mxu1 }
 0x1d4   : > { %v2317_v63 = vadd.f32 %v2316_v62, %v2315_v60  ;;  %v2318_v1 = vpop.f32.mrb[62].mxu0  ;;  %v2375_v2 = vadd.f32 %v2374_v0, %v2373_v61  ;;  %v2376_v3 = vpop.f32.mrb[62].mxu1 }
 0x1d5   : > { %v2319_v4 = vpop.f32.mrb[63].mxu0  ;;  %v2377_v7 = vpop.f32.mrb[63].mxu1 }
 0x1d6   : > { %v1570_v5 = vadd.f32 %v2317_v63, %v3348_v46  ;;  %v2320_v6 = vadd.f32 %v2319_v4, %v2318_v1  ;;  %v2378_v9 = vadd.f32 %v2377_v7, %v2376_v3 }
 0x1d8   : > { %v3357_v10 = vadd.f32 %v2375_v2, %v1570_v5  ;;  %v1573_v12 = vadd.f32 %v2320_v6, %v3348_v46 }
 0x1da   : > { %v3360_v13 = vadd.f32 %v2378_v9, %v1573_v12  ;;  %v2321_v14 = vpop.f32.mrb[64].mxu0  ;;  %v2379_v15 = vpop.f32.mrb[64].mxu1 }
 0x1db   : > { %v2322_v16 = vpop.f32.mrb[65].mxu0  ;;  %v2380_v18 = vpop.f32.mrb[65].mxu1 }
 0x1dc   : > { %v2323_v31 = vadd.f32 %v2322_v16, %v2321_v14  ;;  %v2324_v19 = vpop.f32.mrb[66].mxu0  ;;  %v2381_v20 = vadd.f32 %v2380_v18, %v2379_v15  ;;  %v2382_v21 = vpop.f32.mrb[66].mxu1 }
 0x1dd   : > { %v2325_v22 = vpop.f32.mrb[67].mxu0  ;;  %v2383_v32 = vpop.f32.mrb[67].mxu1 }
 0x1de   : > { %v1578_v23 = vadd.f32 %v2323_v31, %v3348_v46  ;;  %v2326_v24 = vadd.f32 %v2325_v22, %v2324_v19  ;;  %v2384_v25 = vadd.f32 %v2383_v32, %v2382_v21 }
 0x1e0   : > { %v3363_v8 = vadd.f32 %v2381_v20, %v1578_v23  ;;  %v1581_v28 = vadd.f32 %v2326_v24, %v3348_v46 }
 0x1e2   : > { %v3366_v29 = vadd.f32 %v2384_v25, %v1581_v28  ;;  %v2327_v30 = vpop.f32.mrb[68].mxu0  ;;  %v2385_v35 = vpop.f32.mrb[68].mxu1 }
 0x1e3   : > { %v2328_v36 = vpop.f32.mrb[69].mxu0  ;;  %v2386_v37 = vpop.f32.mrb[69].mxu1 }
 0x1e4   : > { %v2329_v34 = vadd.f32 %v2328_v36, %v2327_v30  ;;  %v2330_v38 = vpop.f32.mrb[70].mxu0  ;;  %v2387_v39 = vadd.f32 %v2386_v37, %v2385_v35  ;;  %v2388_v40 = vpop.f32.mrb[70].mxu1 }
 0x1e5   : > { %v2331_v27 = vpop.f32.mrb[71].mxu0  ;;  %v2389_v42 = vpop.f32.mrb[71].mxu1 }
 0x1e6   : > { %v1586_v41 = vadd.f32 %v2329_v34, %v3348_v46  ;;  %v2332_v11 = vadd.f32 %v2331_v27, %v2330_v38  ;;  %v2390_v43 = vadd.f32 %v2389_v42, %v2388_v40 }
 0x1e8   : > { %v3369_v44 = vadd.f32 %v2387_v39, %v1586_v41  ;;  %v1589_v45 = vadd.f32 %v2332_v11, %v3348_v46 }
 0x1ea   : > { %v3372_v17 = vadd.f32 %v2390_v43, %v1589_v45  ;;  %v2333_v26 = vpop.f32.mrb[72].mxu0  ;;  %v2391_v33 = vpop.f32.mrb[72].mxu1 }
 0x1eb   : > { %v2334_v47 = vpop.f32.mrb[73].mxu0  ;;  %v2392_v49 = vpop.f32.mrb[73].mxu1 }
 0x1ec   : > { %v2335_v48 = vadd.f32 %v2334_v47, %v2333_v26  ;;  %v2336_v50 = vpop.f32.mrb[74].mxu0  ;;  %v2393_v51 = vadd.f32 %v2392_v49, %v2391_v33  ;;  %v2394_v52 = vpop.f32.mrb[74].mxu1 }
 0x1ed   : > { %v2337_v53 = vpop.f32.mrb[75].mxu0  ;;  %v2395_v56 = vpop.f32.mrb[75].mxu1 }
 0x1ee   : > { %v1594_v54 = vadd.f32 %v2335_v48, %v3348_v46  ;;  %v2338_v55 = vadd.f32 %v2337_v53, %v2336_v50  ;;  %v2396_v58 = vadd.f32 %v2395_v56, %v2394_v52 }
 0x1f0   : > { %v3375_v60 = vadd.f32 %v2393_v51, %v1594_v54  ;;  %v1597_v61 = vadd.f32 %v2338_v55, %v3348_v46 }
 0x1f2   : > { %v3378_v62 = vadd.f32 %v2396_v58, %v1597_v61  ;;  %v2339_v63 = vpop.f32.mrb[76].mxu0  ;;  %v2397_v0 = vpop.f32.mrb[76].mxu1 }
 0x1f3   : > { %v2340_v1 = vpop.f32.mrb[77].mxu0  ;;  %v2398_v3 = vpop.f32.mrb[77].mxu1 }
 0x1f4   : > { %v2341_v2 = vadd.f32 %v2340_v1, %v2339_v63  ;;  %v2342_v4 = vpop.f32.mrb[78].mxu0  ;;  %v2399_v5 = vadd.f32 %v2398_v3, %v2397_v0  ;;  %v2400_v6 = vpop.f32.mrb[78].mxu1 }
 0x1f5   : > { %v2343_v7 = vpop.f32.mrb[79].mxu0  ;;  %v2401_v14 = vpop.f32.mrb[79].mxu1 }
 0x1f6   : > { %v1602_v9 = vadd.f32 %v2341_v2, %v3348_v46  ;;  %v2344_v12 = vadd.f32 %v2343_v7, %v2342_v4  ;;  %v2402_v15 = vadd.f32 %v2401_v14, %v2400_v6 }
 0x1f8   : > { %v3381_v16 = vadd.f32 %v2399_v5, %v1602_v9  ;;  %v1605_v31 = vadd.f32 %v2344_v12, %v3348_v46 }
 0x1fa   : > { %v3384_v18 = vadd.f32 %v2402_v15, %v1605_v31  ;;  %v2345_v19 = vpop.f32.mrb[80].mxu0  ;;  %v2403_v20 = vpop.f32.mrb[80].mxu1 }
 0x1fb   : > { %v2346_v21 = vpop.f32.mrb[81].mxu0  ;;  %v2404_v23 = vpop.f32.mrb[81].mxu1 }
 0x1fc   : > { %v2347_v22 = vadd.f32 %v2346_v21, %v2345_v19  ;;  %v2348_v24 = vpop.f32.mrb[82].mxu0  ;;  %v2405_v32 = vadd.f32 %v2404_v23, %v2403_v20  ;;  %v2406_v25 = vpop.f32.mrb[82].mxu1 }
 0x1fd   : > { %v2349_v28 = vpop.f32.mrb[83].mxu0  ;;  %v2407_v36 = vpop.f32.mrb[83].mxu1 }
 0x1fe   : > { %v1610_v30 = vadd.f32 %v2347_v22, %v3348_v46  ;;  %v2350_v35 = vadd.f32 %v2349_v28, %v2348_v24  ;;  %v2408_v34 = vadd.f32 %v2407_v36, %v2406_v25 }
 0x200   : > { %v3387_v37 = vadd.f32 %v2405_v32, %v1610_v30  ;;  %v1613_v38 = vadd.f32 %v2350_v35, %v3348_v46 }
 0x202   : > { %v3391_v39 = vadd.f32 %v2408_v34, %v1613_v38  ;;  %v2425_v40 = vpop.f32.mrb[84].mxu0  ;;  %v2483_v27 = vpop.f32.mrb[84].mxu1 }
 0x203   : > { %v2426_v41 = vpop.f32.mrb[85].mxu0  ;;  %v2484_v42 = vpop.f32.mrb[85].mxu1 }
 0x204   : > { %v2427_v11 = vadd.f32 %v2426_v41, %v2425_v40  ;;  %v2428_v43 = vpop.f32.mrb[86].mxu0  ;;  %v2485_v45 = vadd.f32 %v2484_v42, %v2483_v27  ;;  %v2486_v26 = vpop.f32.mrb[86].mxu1 }
 0x205   : > { %v2429_v33 = vpop.f32.mrb[87].mxu0  ;;  %v2487_v49 = vpop.f32.mrb[87].mxu1 }
 0x206   : > { %v1740_v47 = vadd.f32 %v2427_v11, %v3351_v57  ;;  %v2430_v48 = vadd.f32 %v2429_v33, %v2428_v43  ;;  %v2488_v50 = vadd.f32 %v2487_v49, %v2486_v26 }
 0x208   : > { %v1829_v51 = vadd.f32 %v2485_v45, %v1740_v47  ;;  %v1743_v46 = vadd.f32 %v2430_v48, %v3354_v59 }
 0x20a   : > { %1883 = vst.msk [vmem:[%s3395_s18] sm:$0xff] %vm406_vm0, %v1829_v51  ;;  %v1832_v52 = vadd.f32 %v2488_v50, %v1743_v46  ;;  %v2431_v53 = vpop.f32.mrb[88].mxu0  ;;  %v2489_v54 = vpop.f32.mrb[88].mxu1 }
 0x20b   : > { %v2432_v55 = vpop.f32.mrb[89].mxu0  ;;  %v2490_v56 = vpop.f32.mrb[89].mxu1 }
 0x20c   : > { %1884 = vst.msk [vmem:[%s3395_s18 + $0x8] sm:$0xff] %vm406_vm0, %v1832_v52  ;;  %v2433_v57 = vadd.f32 %v2432_v55, %v2431_v53  ;;  %v2434_v58 = vpop.f32.mrb[90].mxu0  ;;  %v2491_v61 = vadd.f32 %v2490_v56, %v2489_v54  ;;  %v2492_v63 = vpop.f32.mrb[90].mxu1 }
 0x20d   : > { %v2435_v59 = vpop.f32.mrb[91].mxu0  ;;  %v2493_v2 = vpop.f32.mrb[91].mxu1 }
 0x20e   : > { %v1748_v0 = vadd.f32 %v2433_v57, %v3357_v10  ;;  %v2436_v1 = vadd.f32 %v2435_v59, %v2434_v58  ;;  %v2494_v3 = vadd.f32 %v2493_v2, %v2492_v63 }
 0x210   : > { %v1837_v4 = vadd.f32 %v2491_v61, %v1748_v0  ;;  %v1751_v5 = vadd.f32 %v2436_v1, %v3360_v13 }
 0x212   : > { %1885 = vst.msk [vmem:[%s3395_s18 + $0x10] sm:$0xff] %vm406_vm0, %v1837_v4  ;;  %v1840_v6 = vadd.f32 %v2494_v3, %v1751_v5  ;;  %v2437_v7 = vpop.f32.mrb[92].mxu0  ;;  %v2495_v9 = vpop.f32.mrb[92].mxu1 }
 0x213   : > { %v2438_v12 = vpop.f32.mrb[93].mxu0  ;;  %v2496_v15 = vpop.f32.mrb[93].mxu1 }
 0x214   : > { %1886 = vst.msk [vmem:[%s3395_s18 + $0x18] sm:$0xff] %vm406_vm0, %v1840_v6  ;;  %v2439_v14 = vadd.f32 %v2438_v12, %v2437_v7  ;;  %v2440_v31 = vpop.f32.mrb[94].mxu0  ;;  %v2497_v10 = vadd.f32 %v2496_v15, %v2495_v9  ;;  %v2498_v19 = vpop.f32.mrb[94].mxu1 }
 0x215   : > { %v2441_v20 = vpop.f32.mrb[95].mxu0  ;;  %v2499_v13 = vpop.f32.mrb[95].mxu1 }
 0x216   : > { %v1756_v21 = vadd.f32 %v2439_v14, %v3363_v8  ;;  %v2442_v22 = vadd.f32 %v2441_v20, %v2440_v31  ;;  %v2500_v23 = vadd.f32 %v2499_v13, %v2498_v19 }
 0x218   : > { %v1845_v24 = vadd.f32 %v2497_v10, %v1756_v21  ;;  %v1759_v32 = vadd.f32 %v2442_v22, %v3366_v29 }
 0x21a   : > { %1887 = vst.msk [vmem:[%s3395_s18 + $0x20] sm:$0xff] %vm406_vm0, %v1845_v24  ;;  %v1848_v25 = vadd.f32 %v2500_v23, %v1759_v32  ;;  %v2443_v28 = vpop.f32.mrb[96].mxu0  ;;  %v2501_v30 = vpop.f32.mrb[96].mxu1 }
 0x21b   : > { %v2444_v35 = vpop.f32.mrb[97].mxu0  ;;  %v2502_v34 = vpop.f32.mrb[97].mxu1 }
 0x21c   : > { %1888 = vst.msk [vmem:[%s3395_s18 + $0x28] sm:$0xff] %vm406_vm0, %v1848_v25  ;;  %v2445_v36 = vadd.f32 %v2444_v35, %v2443_v28  ;;  %v2446_v38 = vpop.f32.mrb[98].mxu0  ;;  %v2503_v8 = vadd.f32 %v2502_v34, %v2501_v30  ;;  %v2504_v40 = vpop.f32.mrb[98].mxu1 }
 0x21d   : > { %v2447_v27 = vpop.f32.mrb[99].mxu0  ;;  %v2505_v29 = vpop.f32.mrb[99].mxu1 }
 0x21e   : > { %v1764_v41 = vadd.f32 %v2445_v36, %v3369_v44  ;;  %v2448_v11 = vadd.f32 %v2447_v27, %v2446_v38  ;;  %v2506_v42 = vadd.f32 %v2505_v29, %v2504_v40 }
 0x220   : > { %v1853_v43 = vadd.f32 %v2503_v8, %v1764_v41  ;;  %v1767_v45 = vadd.f32 %v2448_v11, %v3372_v17 }
 0x222   : > { %1889 = vst.msk [vmem:[%s3395_s18 + $0x30] sm:$0xff] %vm406_vm0, %v1853_v43  ;;  %v1856_v26 = vadd.f32 %v2506_v42, %v1767_v45  ;;  %v2449_v33 = vpop.f32.mrb[100].mxu0  ;;  %v2507_v47 = vpop.f32.mrb[100].mxu1 }
 0x223   : > { %v2450_v48 = vpop.f32.mrb[101].mxu0  ;;  %v2508_v50 = vpop.f32.mrb[101].mxu1 }
 0x224   : > { %1890 = vst.msk [vmem:[%s3395_s18 + $0x38] sm:$0xff] %vm406_vm0, %v1856_v26  ;;  %v2451_v49 = vadd.f32 %v2450_v48, %v2449_v33  ;;  %v2452_v51 = vpop.f32.mrb[102].mxu0  ;;  %v2509_v44 = vadd.f32 %v2508_v50, %v2507_v47  ;;  %v2510_v46 = vpop.f32.mrb[102].mxu1 }
 0x225   : > { %v2453_v52 = vpop.f32.mrb[103].mxu0  ;;  %v2511_v17 = vpop.f32.mrb[103].mxu1 }
 0x226   : > { %v1772_v53 = vadd.f32 %v2451_v49, %v3375_v60  ;;  %v2454_v54 = vadd.f32 %v2453_v52, %v2452_v51  ;;  %v2512_v55 = vadd.f32 %v2511_v17, %v2510_v46 }
 0x228   : > { %v1861_v57 = vadd.f32 %v2509_v44, %v1772_v53  ;;  %v1775_v56 = vadd.f32 %v2454_v54, %v3378_v62 }
 0x22a   : > { %1891 = vst.msk [vmem:[%s3395_s18 + $0x40] sm:$0xff] %vm406_vm0, %v1861_v57  ;;  %v1864_v58 = vadd.f32 %v2512_v55, %v1775_v56  ;;  %v2455_v61 = vpop.f32.mrb[104].mxu0  ;;  %v2513_v63 = vpop.f32.mrb[104].mxu1 }
 0x22b   : > { %v2456_v59 = vpop.f32.mrb[105].mxu0  ;;  %v2514_v1 = vpop.f32.mrb[105].mxu1 }
 0x22c   : > { %1892 = vst.msk [vmem:[%s3395_s18 + $0x48] sm:$0xff] %vm406_vm0, %v1864_v58  ;;  %v2457_v0 = vadd.f32 %v2456_v59, %v2455_v61  ;;  %v2458_v2 = vpop.f32.mrb[106].mxu0  ;;  %v2515_v60 = vadd.f32 %v2514_v1, %v2513_v63  ;;  %v2516_v3 = vpop.f32.mrb[106].mxu1 }
 0x22d   : > { %v2459_v4 = vpop.f32.mrb[107].mxu0  ;;  %v2517_v62 = vpop.f32.mrb[107].mxu1 }
 0x22e   : > { %v1780_v5 = vadd.f32 %v2457_v0, %v3381_v16  ;;  %v2460_v6 = vadd.f32 %v2459_v4, %v2458_v2  ;;  %v2518_v7 = vadd.f32 %v2517_v62, %v2516_v3 }
 0x230   : > { %v1869_v9 = vadd.f32 %v2515_v60, %v1780_v5  ;;  %v1783_v12 = vadd.f32 %v2460_v6, %v3384_v18 }
 0x232   : > { %1893 = vst.msk [vmem:[%s3395_s18 + $0x50] sm:$0xff] %vm406_vm0, %v1869_v9  ;;  %v1872_v14 = vadd.f32 %v2518_v7, %v1783_v12  ;;  %v2461_v15 = vpop.f32.mrb[108].mxu0  ;;  %v2519_v31 = vpop.f32.mrb[108].mxu1 }
 0x233   : > { %v2462_v10 = vpop.f32.mrb[109].mxu0  ;;  %v2520_v20 = vpop.f32.mrb[109].mxu1 }
 0x234   : > { %1894 = vst.msk [vmem:[%s3395_s18 + $0x58] sm:$0xff] %vm406_vm0, %v1872_v14  ;;  %v2463_v19 = vadd.f32 %v2462_v10, %v2461_v15  ;;  %v2464_v21 = vpop.f32.mrb[110].mxu0  ;;  %v2521_v16 = vadd.f32 %v2520_v20, %v2519_v31  ;;  %v2522_v22 = vpop.f32.mrb[110].mxu1 }
 0x235   : > { %v2465_v13 = vpop.f32.mrb[111].mxu0  ;;  %v2523_v18 = vpop.f32.mrb[111].mxu1 }
 0x236   : > { %v1788_v23 = vadd.f32 %v2463_v19, %v3387_v37  ;;  %v2466_v24 = vadd.f32 %v2465_v13, %v2464_v21  ;;  %v2524_v32 = vadd.f32 %v2523_v18, %v2522_v22  ;;  %1903 = sbr.rel (!%p2828_p4) target bundleno = 634 (0x27a), region = 44 }
 0x238   : > { %v1877_v25 = vadd.f32 %v2521_v16, %v1788_v23  ;;  %v1791_v28 = vadd.f32 %v2466_v24, %v3391_v39 }
 0x23a   : > { %1895 = vst.msk [vmem:[%s3395_s18 + $0x60] sm:$0xff] %vm406_vm0, %v1877_v25  ;;  %v1880_v30 = vadd.f32 %v2524_v32, %v1791_v28 }
 0x23c   : > { %1896 = vst.msk [vmem:[%s3395_s18 + $0x68] sm:$0xff] %vm406_vm0, %v1880_v30 }
 0x23d   : > { %s3542_s12 = smov (!%p1906_p8, %s1905_s12), 14 }
 0x23e   : > { %s2280_s17 = sshll.u32 %s3542_s12, 7 }
 0x23f   : > { %p2283_p9 = scmp.eq.s32.totalorder %s2280_s17, 0 }
 0x240   : > { %2680 = sdivrem.u32 (!%p2283_p9), %s3542_s12, 14 }
 0x241   : > { %1914 = sbr.rel (%p2283_p9) target bundleno = 634 (0x27a), region = 48 }
 0x249   : > { %s3450_s26 = spop.drf %2680 }
 0x24a   : > { %p2284_p10 = scmp.le.s32.totalorder %s3450_s26, 0 }
 0x24b   : > { %s3535_s21 = smov (!%p2284_p10), %s3444_s16  ;;  %s3536_s8 = smov (!%p2284_p10), %s3395_s18 }
 0x24c   : > { %2122 = sbr.rel (%p2284_p10) target bundleno = 605 (0x25d), region = 124  ;;  %s3459_s20 = smov (!%p2284_p10), 0  }
 0x24d   : > { %s3461_s23 = smov (!%p2284_p10), 0  }
 0x253 LB: >> { %v2004_v37 = vld [vmem:[%s2746_s8] sm:$0xff]  ;;  %v2006_v39 = vld [vmem:[%s2746_s8 + $0x8] sm:$0xff]  ;;  %v2008_v35 = vld [vmem:[%s2746_s8 + $0x10] sm:$0xff]  ;;  %s2032_s24 = sadd.s32 1, %s2750_s20  ;;  %s1998_s23 = sadd.s32 1, %s2754_s23   ;;  %s2754_s23 = sphi %s3461_s23, %s1998_s23   ;;  %s2750_s20 = sphi %s3459_s20, %s3537_s20   ;;  %s2746_s8 = sphi %s3536_s8, %s2037_s8   ;;  %s2742_s21 = sphi %s3535_s21, %s2038_s21  }
 0x254   : >> { %2005 = vst [vmem:[%s2742_s21] sm:$0xff] %v2004_v37  ;;  %2007 = vst [vmem:[%s2742_s21 + $0x8] sm:$0xff] %v2006_v39  ;;  %v2010_v36 = vld [vmem:[%s2746_s8 + $0x18] sm:$0xff]  ;;  %v2012_v34 = vld [vmem:[%s2746_s8 + $0x20] sm:$0xff]  ;;  %p2033_p11 = scmp.ge.s32.totalorder %s2032_s24, %s3450_s26  ;;  %p1997_p12 = scmp.ge.s32.totalorder %s1998_s23, %s3450_s26 }
 0x255   : >> { %2009 = vst [vmem:[%s2742_s21 + $0x10] sm:$0xff] %v2008_v35  ;;  %v2014_v38 = vld [vmem:[%s2746_s8 + $0x28] sm:$0xff]  ;;  %2011 = vst [vmem:[%s2742_s21 + $0x18] sm:$0xff] %v2010_v36  ;;  %v2016_v8 = vld [vmem:[%s2746_s8 + $0x30] sm:$0xff] }
 0x256   : >> { %2013 = vst [vmem:[%s2742_s21 + $0x20] sm:$0xff] %v2012_v34  ;;  %2015 = vst [vmem:[%s2742_s21 + $0x28] sm:$0xff] %v2014_v38  ;;  %v2018_v40 = vld [vmem:[%s2746_s8 + $0x38] sm:$0xff]  ;;  %v2020_v27 = vld [vmem:[%s2746_s8 + $0x40] sm:$0xff]  ;;  %s3544_s24 = smov (%p2033_p11, %s2032_s24), 0  ;;  %2000 = sbr.rel (!%p1997_p12) target bundleno = 595 (0x253), region = 130 }
 0x257   : >> { %2017 = vst [vmem:[%s2742_s21 + $0x30] sm:$0xff] %v2016_v8  ;;  %2019 = vst [vmem:[%s2742_s21 + $0x38] sm:$0xff] %v2018_v40  ;;  %v2022_v41 = vld [vmem:[%s2746_s8 + $0x48] sm:$0xff]  ;;  %v2024_v11 = vld [vmem:[%s2746_s8 + $0x50] sm:$0xff]  ;;  %s2035_s27 = smul.u32 112, %s3544_s24  ;;  %s3537_s20 = smov %s3544_s24 }
 0x258   : >> { %2021 = vst [vmem:[%s2742_s21 + $0x40] sm:$0xff] %v2020_v27  ;;  %v2026_v29 = vld [vmem:[%s2746_s8 + $0x58] sm:$0xff]  ;;  %2023 = vst [vmem:[%s2742_s21 + $0x48] sm:$0xff] %v2022_v41  ;;  %v2028_v42 = vld [vmem:[%s2746_s8 + $0x60] sm:$0xff] }
 0x259   : >> { %2025 = vst [vmem:[%s2742_s21 + $0x50] sm:$0xff] %v2024_v11  ;;  %2027 = vst [vmem:[%s2742_s21 + $0x58] sm:$0xff] %v2026_v29  ;;  %v2030_v43 = vld [vmem:[%s2746_s8 + $0x68] sm:$0xff]  ;;  %s2037_s8 = scalar_lea.vmem %s3395_s18, %s2035_s27 [#allocation2]  }
 0x25a   : >> { %2029 = vst [vmem:[%s2742_s21 + $0x60] sm:$0xff] %v2028_v42  ;;  %2031 = vst [vmem:[%s2742_s21 + $0x68] sm:$0xff] %v2030_v43  ;;  %s2038_s21 = scalar_lea.vmem %s3444_s16, %s2035_s27  }
 0x25d PF: > { %2682 = sdivrem.u32 %s3542_s12, 14 }
 0x25e   : > { %s2285_s28 = smul.u32 112, %s3450_s26 }
 0x260   : > { %s2043_s29 = scalar_lea.vmem %s3395_s18, %s2285_s28 [#allocation2]   ;;  %s2045_s30 = scalar_lea.vmem %s3444_s16, %s2285_s28  }
 0x266   : > { %s2683_s6 = spop.drf %2682 }
 0x267   : > { %p2287_p13 = scmp.le.s32.totalorder %s2683_s6, 0 }
 0x268   : > { %s2756_s7 = smov (!%p2287_p13), %s2045_s30   ;;  %s2760_s9 = smov (!%p2287_p13), %s2043_s29  }
 0x269   : > { %2136 = sbr.rel (%p2287_p13) target bundleno = 634 (0x27a), region = 135  ;;  %s2764_s10 = smov (!%p2287_p13), 0  }
 0x26a   : > { %s2768_s11 = smov (!%p2287_p13), 0  }
 0x270 LB: >> { %v2055_v45 = vld [vmem:[%s2762_s9] sm:$0xff]  ;;  %s2057_s13 = sadd.s32 1, %s2766_s10  ;;  %s2049_s11 = sadd.s32 1, %s2770_s11   ;;  %s2770_s11 = sphi %s2768_s11, %s2049_s11   ;;  %s2766_s10 = sphi %s2764_s10, %s2765_s10   ;;  %s2762_s9 = sphi %s2760_s9, %s2062_s9   ;;  %s2758_s7 = sphi %s2756_s7, %s2063_s7  }
 0x271   : >> { %2056 = vst [vmem:[%s2758_s7] sm:$0xff] %v2055_v45  ;;  %p2058_p0 = scmp.ge.s32.totalorder %s2057_s13, %s2683_s6  ;;  %p2048_p1 = scmp.ge.s32.totalorder %s2049_s11, %s2683_s6 }
 0x273   : >> { %s3546_s13 = smov (%p2058_p0, %s2057_s13), 0  ;;  %2051 = sbr.rel (!%p2048_p1) target bundleno = 624 (0x270), region = 141 }
 0x274   : >> { %s2288_s18 = sshll.u32 %s3546_s13, 3  ;;  %s2765_s10 = smov %s3546_s13  }
 0x275   : >> { %s2062_s9 = scalar_lea.vmem %s2043_s29, %s2288_s18 [#allocation2]   ;;  %s2063_s7 = scalar_lea.vmem %s2045_s30, %s2288_s18  }
 0x27a PF: > { %p12_p2 = scmp.ge.s32.totalorder %s2818_s22, 4   ;;  %s3538_s18 = smov %s2734_s19 }
 0x27b   : > { %s3539_s19 = smov %s2826_s25  ;;  %s3540_s20 = smov %s2818_s22 }
 0x27c   :  { %14 = sbr.rel (!%p12_p2) target bundleno = 2 (0x2), region = 152 }

</bundles_post_ra>
